<compile_context>
chip_gen: v5e
topology: v5e:2x2
jax: 0.10.0
libtpu: 0.0.40
codegen_flags: <defaults>
</compile_context>

<pallas_src>
import functools
import math

import jax
import jax.numpy as jnp
from jax.experimental import pallas as pl
from jax.experimental.pallas import tpu as pltpu


# ---------------------------------------------------------------------------
# Kernel
# ---------------------------------------------------------------------------
def _layernorm_f32(x, gamma, beta, eps=1e-5):
    mu = jnp.mean(x, axis=-1, keepdims=True)
    var = jnp.mean((x - mu) ** 2, axis=-1, keepdims=True)
    return (x - mu) * jax.lax.rsqrt(var + eps) * gamma + beta


def _gelu(x, approximate):
    if approximate:
        # tanh form -> EUP slot (frees VALU); slight deviation from exact erf GELU.
        c = math.sqrt(2.0 / math.pi)
        return 0.5 * x * (1.0 + jnp.tanh(c * (x + 0.044715 * x * x * x)))
    # PyTorch nn.GELU() default = exact erf-based GELU.
    return 0.5 * x * (1.0 + jax.lax.erf(x * (1.0 / math.sqrt(2.0))))


def cross_modal_attention_kernel(
    # one (bm, E) batch tile of activations + VMEM-resident weights
    q_ref, kv_ref,                    # f32 (bm, E)
    wvo_ref, w1_ref, w2_ref,          # bf16 (E,E), (E,2E), (2E,E)
    bias_ref,                         # f32 (8, 2E) packed bias/gain slab
    out_ref,                          # f32 (bm, E)
    *, embed_dim, approx_gelu,
):
    E = embed_dim
    # Packed bias slab rows: 0=b_vo 1=gamma1 2=beta1 3=b1(2E) 4=b2 5=gamma2 6=beta2.
    b_vo = bias_ref[0:1, :E]
    g1 = bias_ref[1:2, :E]
    be1 = bias_ref[2:3, :E]
    b1 = bias_ref[3:4, :]
    b2 = bias_ref[4:5, :E]
    g2 = bias_ref[5:6, :E]
    be2 = bias_ref[6:7, :E]

    x_q = q_ref[...].astype(jnp.float32)
    x_kv = kv_ref[...].astype(jnp.float32)

    # --- attention (seq len 1 => softmax == 1 => attn == v), Wv@Wo pre-folded ---
    attn_out = (
        jnp.dot(x_kv.astype(jnp.bfloat16), wvo_ref[...],
                preferred_element_type=jnp.float32)
        + b_vo
    )

    # --- residual + LayerNorm 1 (f32) ---
    out1 = _layernorm_f32(x_q + attn_out, g1, be1)

    # --- feed-forward: Linear(E, 2E) -> GELU -> Linear(2E, E) (dropouts identity) ---
    h = (
        jnp.dot(out1.astype(jnp.bfloat16), w1_ref[...],
                preferred_element_type=jnp.float32)
        + b1
    )
    h = _gelu(h, approx_gelu)
    ff = (
        jnp.dot(h.astype(jnp.bfloat16), w2_ref[...],
                preferred_element_type=jnp.float32)
        + b2
    )

    # --- residual + LayerNorm 2 (f32) ---
    out2 = _layernorm_f32(out1 + ff, g2, be2)
    out_ref[...] = out2.astype(out_ref.dtype)


# ---------------------------------------------------------------------------
# Host-side sizing helpers
# ---------------------------------------------------------------------------
def _round_up(x, m):
    return ((x + m - 1) // m) * m


def _vmem_capacity_bytes():
    try:
        return int(pltpu.get_tpu_info().vmem_capacity_bytes)
    except Exception:
        return 128 << 20  # v5e/v6e default; conservative fallback


def _default_block_m():
    # 64 MiB VMEM parts (v7x): 256-row tiles; 128 MiB parts (v5e/v6e): 512-row tiles.
    return 256 if _vmem_capacity_bytes() <= (64 << 20) else 512


def _choose_bm(B, block_m):
    """Sublane-aligned batch tile: <= block_m, >= 2 grid steps when B > 8 (megacore),
    preferring a tile that divides B so no host-side pad copy is needed."""
    bm = min(block_m, _round_up(B, 8))
    if B > 8:
        bm = min(bm, _round_up((B + 1) // 2, 8))  # at least 2 grid steps for 2 TCs
    bm = max(bm, 8)
    for cand in range(bm, 7, -8):  # largest multiple of 8 that divides B, if any
        if B % cand == 0:
            return cand
    return bm


# ---------------------------------------------------------------------------
# Parameters & wrapper
# ---------------------------------------------------------------------------
def make_params(key, embedding_dim, num_heads):
    del num_heads
    E = embedding_dim
    ks = jax.random.split(key, 8)
    std = 0.02
    return {
        "wq": jax.random.normal(ks[0], (E, E), jnp.float32) * std,
        "wk": jax.random.normal(ks[1], (E, E), jnp.float32) * std,
        "wv": jax.random.normal(ks[2], (E, E), jnp.float32) * std,
        "wo": jax.random.normal(ks[3], (E, E), jnp.float32) * std,
        "bq": jnp.zeros((1, E), jnp.float32),
        "bk": jnp.zeros((1, E), jnp.float32),
        "bv": jnp.zeros((1, E), jnp.float32),
        "bo": jnp.zeros((1, E), jnp.float32),
        "g1": jnp.ones((1, E), jnp.float32),
        "be1": jnp.zeros((1, E), jnp.float32),
        "w1": jax.random.normal(ks[4], (E, 2 * E), jnp.float32) * std,
        "b1": jax.random.normal(ks[5], (1, 2 * E), jnp.float32) * std,
        "w2": jax.random.normal(ks[6], (2 * E, E), jnp.float32) * std,
        "b2": jax.random.normal(ks[7], (1, E), jnp.float32) * std,
        "g2": jnp.ones((1, E), jnp.float32),
        "be2": jnp.zeros((1, E), jnp.float32),
    }


def cross_modal_attention(query, key_value, params, num_heads,
                          block_m=None, approx_gelu=False):
    B, E = query.shape
    del num_heads  # head split is a no-op for seq len 1 (softmax over one key == 1)
    if block_m is None:
        block_m = _default_block_m()

    # --- fold the (dead-attention-simplified) value+output projections; bf16 weights ---
    w_vo = (params["wv"] @ params["wo"]).astype(jnp.bfloat16)            # (E, E)
    b_vo = params["bv"] @ params["wo"] + params["bo"]                    # (1, E)  f32
    w1 = params["w1"].astype(jnp.bfloat16)                               # (E, 2E)
    w2 = params["w2"].astype(jnp.bfloat16)                               # (2E, E)

    # --- pack the 7 tiny bias/gain vectors into one resident (8, 2E) f32 slab ---
    zeros_e = jnp.zeros((1, E), jnp.float32)
    bias_slab = jnp.concatenate(
        [
            jnp.concatenate([b_vo, zeros_e], axis=1),
            jnp.concatenate([params["g1"], zeros_e], axis=1),
            jnp.concatenate([params["be1"], zeros_e], axis=1),
            params["b1"],
            jnp.concatenate([params["b2"], zeros_e], axis=1),
            jnp.concatenate([params["g2"], zeros_e], axis=1),
            jnp.concatenate([params["be2"], zeros_e], axis=1),
            jnp.zeros((1, 2 * E), jnp.float32),
        ],
        axis=0,
    )  # (8, 2E)

    # --- batch tiling (pads only when no multiple-of-8 tile divides B) ---
    bm = _choose_bm(B, block_m)
    n_blocks = pl.cdiv(B, bm)
    Bp = n_blocks * bm
    q_in, kv_in = query, key_value
    if Bp != B:
        pad = Bp - B
        q_in = jnp.pad(q_in, ((0, pad), (0, 0)))
        kv_in = jnp.pad(kv_in, ((0, pad), (0, 0)))

    act_spec = pl.BlockSpec((bm, E), lambda i: (i, 0))
    weights = [w_vo, w1, w2, bias_slab]

    # --- VMEM budget (bf16 weights single-buffered + double-buffered f32 act tiles) ---
    w_bytes = 5 * E * E * 2                         # w_vo + w1 + w2 in bf16
    bias_bytes = 8 * 2 * E * 4
    act_bytes = 3 * 2 * bm * E * 4                  # q, kv, out tiles, double-buffered
    live_bytes = 10 * bm * E * 4                    # f32 intermediates + bf16 copies
    need = w_bytes + bias_bytes + act_bytes + live_bytes + (2 << 20)
    vmem_limit = int(min(max(need, 32 << 20), _vmem_capacity_bytes() - (2 << 20)))

    # Advisory cost estimate (bf16 weight traffic, f32 activations).
    flops = 2 * Bp * E * E + 2 * Bp * E * (2 * E) + 2 * Bp * (2 * E) * E
    bytes_accessed = (w_bytes + bias_bytes) + 3 * Bp * E * 4
    cost = pl.CostEstimate(
        flops=flops,
        transcendentals=Bp * 2 * E,                 # erf/tanh over the (Bp, 2E) hidden
        bytes_accessed=bytes_accessed,
    )

    kernel = functools.partial(
        cross_modal_attention_kernel, embed_dim=E, approx_gelu=approx_gelu)

    def _run(single_buffer_weights):
        def resident_spec(shape):
            # Constant index_map -> weights stay VMEM-resident across all batch tiles;
            # single-buffered since they never change (halves their VMEM footprint).
            if single_buffer_weights:
                return pl.BlockSpec(shape, lambda i: (0, 0),
                                    pipeline_mode=pl.Buffered(1))
            return pl.BlockSpec(shape, lambda i: (0, 0))

        return pl.pallas_call(
            kernel,
            grid=(n_blocks,),
            in_specs=[act_spec, act_spec] + [resident_spec(w.shape) for w in weights],
            out_specs=act_spec,
            out_shape=jax.ShapeDtypeStruct((Bp, E), jnp.float32),
            compiler_params=pltpu.CompilerParams(
                dimension_semantics=("parallel",),
                vmem_limit_bytes=vmem_limit,
            ),
            cost_estimate=cost,
        )(q_in, kv_in, *weights)

    try:
        out = _run(single_buffer_weights=True)
    except Exception:
        # Fallback for jax versions where Buffered(1) resident inputs are rejected.
        out = _run(single_buffer_weights=False)

    return out[:B] if Bp != B else out


# ---------------------------------------------------------------------------
# Pure-JAX reference mirroring the PyTorch forward (eval mode, full MHA path)
# ---------------------------------------------------------------------------
def reference(query, key_value, params, num_heads):
    B, E = query.shape
    D = E // num_heads
    q = query @ params["wq"] + params["bq"]
    k = key_value @ params["wk"] + params["bk"]
    v = key_value @ params["wv"] + params["bv"]
    qh = q.reshape(B, num_heads, 1, D)
    kh = k.reshape(B, num_heads, 1, D)
    vh = v.reshape(B, num_heads, 1, D)
    scores = jnp.einsum("bhqd,bhkd->bhqk", qh, kh) / math.sqrt(D)
    probs = jax.nn.softmax(scores, axis=-1)
    attn = jnp.einsum("bhqk,bhkd->bhqd", probs, vh).reshape(B, E)
    attn_out = attn @ params["wo"] + params["bo"]

    def ln(x, g, b):
        mu = jnp.mean(x, axis=-1, keepdims=True)
        var = jnp.mean((x - mu) ** 2, axis=-1, keepdims=True)
        return (x - mu) / jnp.sqrt(var + 1e-5) * g + b

    out1 = ln(query + attn_out, params["g1"], params["be1"])
    h = out1 @ params["w1"] + params["b1"]
    h = 0.5 * h * (1.0 + jax.lax.erf(h / math.sqrt(2.0)))
    ff = h @ params["w2"] + params["b2"]
    return ln(out1 + ff, params["g2"], params["be2"])


if __name__ == "__main__":
    B = 8           # batch
    E = 128         # embedding_dim
    H = 8           # num_heads

    key = jax.random.PRNGKey(0)
    kq, kkv, kp = jax.random.split(key, 3)
    query = jax.random.normal(kq, (B, E), jnp.float32)
    key_value = jax.random.normal(kkv, (B, E), jnp.float32)
    params = make_params(kp, E, H)

    out = cross_modal_attention(query, key_value, params, H)
    out = jax.block_until_ready(out)

    ref = reference(query, key_value, params, H)
    assert out.shape == (B, E)
    # bf16 MXU operands (f32 accumulation) -> loosened tolerance vs f32 reference.
    assert jnp.allclose(out, ref, atol=2e-2, rtol=2e-2), (
        f"max abs err {jnp.max(jnp.abs(out - ref))}")

    print("KERNEL_OK")
</pallas_src>

<mosaic_0001>
module attributes {stable_mosaic.version = 11 : i64} {
  func.func @cross_modal_attention_kernel(%arg0: i32, %arg1: memref<8x128xf32, #tpu.memory_space<vmem>>, %arg2: memref<8x128xf32, #tpu.memory_space<vmem>>, %arg3: memref<128x128xbf16, #tpu.memory_space<vmem>>, %arg4: memref<128x256xbf16, #tpu.memory_space<vmem>>, %arg5: memref<256x128xbf16, #tpu.memory_space<vmem>>, %arg6: memref<8x256xf32, #tpu.memory_space<vmem>>, %arg7: memref<8x128xf32, #tpu.memory_space<vmem>>) attributes {dimension_semantics = [#tpu.dimension_semantics<parallel>], iteration_bounds = array<i64: 1>, scalar_prefetch = 0 : i64, scratch_operands = 0 : i64, tpu.core_type = #tpu.core_type<tc>, window_params = [{transform_indices = @transform_0, window_bounds = array<i64: 8, 128>}, {transform_indices = @transform_1, window_bounds = array<i64: 8, 128>}, {pipeline_mode = #tpu.pipeline_mode<synchronous>, transform_indices = @transform_2, window_bounds = array<i64: 128, 128>}, {pipeline_mode = #tpu.pipeline_mode<synchronous>, transform_indices = @transform_3, window_bounds = array<i64: 128, 256>}, {pipeline_mode = #tpu.pipeline_mode<synchronous>, transform_indices = @transform_4, window_bounds = array<i64: 256, 128>}, {pipeline_mode = #tpu.pipeline_mode<synchronous>, transform_indices = @transform_5, window_bounds = array<i64: 8, 256>}, {transform_indices = @transform_6, window_bounds = array<i64: 8, 128>}]} {
    %c0 = arith.constant 0 : index
    %c0_0 = arith.constant 0 : index
    %0 = vector.load %arg6[%c0, %c0_0] : memref<8x256xf32, #tpu.memory_space<vmem>>, vector<1x128xf32>
    %c1 = arith.constant 1 : index
    %c0_1 = arith.constant 0 : index
    %1 = vector.load %arg6[%c1, %c0_1] : memref<8x256xf32, #tpu.memory_space<vmem>>, vector<1x128xf32>
    %c2 = arith.constant 2 : index
    %c0_2 = arith.constant 0 : index
    %2 = vector.load %arg6[%c2, %c0_2] : memref<8x256xf32, #tpu.memory_space<vmem>>, vector<1x128xf32>
    %c3 = arith.constant 3 : index
    %c0_3 = arith.constant 0 : index
    %3 = vector.load %arg6[%c3, %c0_3] : memref<8x256xf32, #tpu.memory_space<vmem>>, vector<1x256xf32>
    %c4 = arith.constant 4 : index
    %c0_4 = arith.constant 0 : index
    %4 = vector.load %arg6[%c4, %c0_4] : memref<8x256xf32, #tpu.memory_space<vmem>>, vector<1x128xf32>
    %c5 = arith.constant 5 : index
    %c0_5 = arith.constant 0 : index
    %5 = vector.load %arg6[%c5, %c0_5] : memref<8x256xf32, #tpu.memory_space<vmem>>, vector<1x128xf32>
    %c6 = arith.constant 6 : index
    %c0_6 = arith.constant 0 : index
    %6 = vector.load %arg6[%c6, %c0_6] : memref<8x256xf32, #tpu.memory_space<vmem>>, vector<1x128xf32>
    %c0_7 = arith.constant 0 : index
    %c0_8 = arith.constant 0 : index
    %7 = vector.load %arg1[%c0_7, %c0_8] : memref<8x128xf32, #tpu.memory_space<vmem>>, vector<8x128xf32>
    %c0_9 = arith.constant 0 : index
    %c0_10 = arith.constant 0 : index
    %8 = vector.load %arg2[%c0_9, %c0_10] : memref<8x128xf32, #tpu.memory_space<vmem>>, vector<8x128xf32>
    %9 = arith.truncf %8 : vector<8x128xf32> to vector<8x128xbf16>
    %c0_11 = arith.constant 0 : index
    %c0_12 = arith.constant 0 : index
    %10 = vector.load %arg3[%c0_11, %c0_12] : memref<128x128xbf16, #tpu.memory_space<vmem>>, vector<128x128xbf16>
    %cst = arith.constant dense<0.000000e+00> : vector<8x128xf32>
    %11 = tpu.matmul %9, %10, %cst {dimension_numbers = #tpu.dot_dimension_numbers<[1], [0], [0], [1], [0, 0, 1, 1], [], []>} : vector<8x128xbf16>, vector<128x128xbf16>, vector<8x128xf32> -> vector<8x128xf32>
    %12 = vector.broadcast %0 : vector<1x128xf32> to vector<8x128xf32>
    %13 = arith.addf %11, %12 : vector<8x128xf32>
    %14 = arith.addf %7, %13 : vector<8x128xf32>
    %cst_13 = arith.constant dense<0.000000e+00> : vector<8xf32>
    %15 = vector.multi_reduction <add>, %14, %cst_13 [1] : vector<8x128xf32> to vector<8xf32>
    %16 = vector.shape_cast %15 : vector<8xf32> to vector<8x1xf32>
    %cst_14 = arith.constant 1.280000e+02 : f32
    %17 = vector.broadcast %cst_14 : f32 to vector<8x1xf32>
    %18 = arith.divf %16, %17 : vector<8x1xf32>
    %19 = vector.broadcast %18 : vector<8x1xf32> to vector<8x128xf32>
    %20 = arith.subf %14, %19 : vector<8x128xf32>
    %21 = arith.mulf %20, %20 : vector<8x128xf32>
    %cst_15 = arith.constant dense<0.000000e+00> : vector<8xf32>
    %22 = vector.multi_reduction <add>, %21, %cst_15 [1] : vector<8x128xf32> to vector<8xf32>
    %23 = vector.shape_cast %22 : vector<8xf32> to vector<8x1xf32>
    %cst_16 = arith.constant 1.280000e+02 : f32
    %24 = vector.broadcast %cst_16 : f32 to vector<8x1xf32>
    %25 = arith.divf %23, %24 : vector<8x1xf32>
    %26 = vector.broadcast %18 : vector<8x1xf32> to vector<8x128xf32>
    %27 = arith.subf %14, %26 : vector<8x128xf32>
    %cst_17 = arith.constant 9.99999974E-6 : f32
    %28 = vector.broadcast %cst_17 : f32 to vector<8x1xf32>
    %29 = arith.addf %25, %28 : vector<8x1xf32>
    %30 = math.rsqrt %29 : vector<8x1xf32>
    %31 = vector.broadcast %30 : vector<8x1xf32> to vector<8x128xf32>
    %32 = arith.mulf %27, %31 : vector<8x128xf32>
    %33 = vector.broadcast %1 : vector<1x128xf32> to vector<8x128xf32>
    %34 = arith.mulf %32, %33 : vector<8x128xf32>
    %35 = vector.broadcast %2 : vector<1x128xf32> to vector<8x128xf32>
    %36 = arith.addf %34, %35 : vector<8x128xf32>
    %37 = arith.truncf %36 : vector<8x128xf32> to vector<8x128xbf16>
    %c0_18 = arith.constant 0 : index
    %c0_19 = arith.constant 0 : index
    %38 = vector.load %arg4[%c0_18, %c0_19] : memref<128x256xbf16, #tpu.memory_space<vmem>>, vector<128x256xbf16>
    %cst_20 = arith.constant dense<0.000000e+00> : vector<8x256xf32>
    %39 = tpu.matmul %37, %38, %cst_20 {dimension_numbers = #tpu.dot_dimension_numbers<[1], [0], [0], [1], [0, 0, 1, 1], [], []>} : vector<8x128xbf16>, vector<128x256xbf16>, vector<8x256xf32> -> vector<8x256xf32>
    %40 = vector.broadcast %3 : vector<1x256xf32> to vector<8x256xf32>
    %41 = arith.addf %39, %40 : vector<8x256xf32>
    %cst_21 = arith.constant 5.000000e-01 : f32
    %42 = vector.broadcast %cst_21 : f32 to vector<8x256xf32>
    %43 = arith.mulf %42, %41 : vector<8x256xf32>
    %cst_22 = arith.constant 0.707106769 : f32
    %44 = vector.broadcast %cst_22 : f32 to vector<8x256xf32>
    %45 = arith.mulf %41, %44 : vector<8x256xf32>
    %46 = math.erf %45 : vector<8x256xf32>
    %cst_23 = arith.constant 1.000000e+00 : f32
    %47 = vector.broadcast %cst_23 : f32 to vector<8x256xf32>
    %48 = arith.addf %47, %46 : vector<8x256xf32>
    %49 = arith.mulf %43, %48 : vector<8x256xf32>
    %50 = arith.truncf %49 : vector<8x256xf32> to vector<8x256xbf16>
    %c0_24 = arith.constant 0 : index
    %c0_25 = arith.constant 0 : index
    %51 = vector.load %arg5[%c0_24, %c0_25] : memref<256x128xbf16, #tpu.memory_space<vmem>>, vector<256x128xbf16>
    %cst_26 = arith.constant dense<0.000000e+00> : vector<8x128xf32>
    %52 = tpu.matmul %50, %51, %cst_26 {dimension_numbers = #tpu.dot_dimension_numbers<[1], [0], [0], [1], [0, 0, 1, 1], [], []>} : vector<8x256xbf16>, vector<256x128xbf16>, vector<8x128xf32> -> vector<8x128xf32>
    %53 = vector.broadcast %4 : vector<1x128xf32> to vector<8x128xf32>
    %54 = arith.addf %52, %53 : vector<8x128xf32>
    %55 = arith.addf %36, %54 : vector<8x128xf32>
    %cst_27 = arith.constant dense<0.000000e+00> : vector<8xf32>
    %56 = vector.multi_reduction <add>, %55, %cst_27 [1] : vector<8x128xf32> to vector<8xf32>
    %57 = vector.shape_cast %56 : vector<8xf32> to vector<8x1xf32>
    %cst_28 = arith.constant 1.280000e+02 : f32
    %58 = vector.broadcast %cst_28 : f32 to vector<8x1xf32>
    %59 = arith.divf %57, %58 : vector<8x1xf32>
    %60 = vector.broadcast %59 : vector<8x1xf32> to vector<8x128xf32>
    %61 = arith.subf %55, %60 : vector<8x128xf32>
    %62 = arith.mulf %61, %61 : vector<8x128xf32>
    %cst_29 = arith.constant dense<0.000000e+00> : vector<8xf32>
    %63 = vector.multi_reduction <add>, %62, %cst_29 [1] : vector<8x128xf32> to vector<8xf32>
    %64 = vector.shape_cast %63 : vector<8xf32> to vector<8x1xf32>
    %cst_30 = arith.constant 1.280000e+02 : f32
    %65 = vector.broadcast %cst_30 : f32 to vector<8x1xf32>
    %66 = arith.divf %64, %65 : vector<8x1xf32>
    %67 = vector.broadcast %59 : vector<8x1xf32> to vector<8x128xf32>
    %68 = arith.subf %55, %67 : vector<8x128xf32>
    %cst_31 = arith.constant 9.99999974E-6 : f32
    %69 = vector.broadcast %cst_31 : f32 to vector<8x1xf32>
    %70 = arith.addf %66, %69 : vector<8x1xf32>
    %71 = math.rsqrt %70 : vector<8x1xf32>
    %72 = vector.broadcast %71 : vector<8x1xf32> to vector<8x128xf32>
    %73 = arith.mulf %68, %72 : vector<8x128xf32>
    %74 = vector.broadcast %5 : vector<1x128xf32> to vector<8x128xf32>
    %75 = arith.mulf %73, %74 : vector<8x128xf32>
    %76 = vector.broadcast %6 : vector<1x128xf32> to vector<8x128xf32>
    %77 = arith.addf %75, %76 : vector<8x128xf32>
    %c0_32 = arith.constant 0 : index
    %c0_33 = arith.constant 0 : index
    %78 = vector.load %arg7[%c0_32, %c0_33] : memref<8x128xf32, #tpu.memory_space<vmem>>, vector<8x128xf32>
    tpu.vector_store %arg7[%c0_32, %c0_33], %77 {strides = array<i32>} : memref<8x128xf32, #tpu.memory_space<vmem>>, vector<8x128xf32>,
    return
  }
  func.func @transform_0(%arg0: i32) -> (i32, i32) {
    %c0_i32 = arith.constant 0 : i32
    %c0_i32_0 = arith.constant 0 : i32
    return %arg0, %c0_i32 : i32, i32
  }
  func.func @transform_1(%arg0: i32) -> (i32, i32) {
    %c0_i32 = arith.constant 0 : i32
    %c0_i32_0 = arith.constant 0 : i32
    return %arg0, %c0_i32 : i32, i32
  }
  func.func @transform_2(%arg0: i32) -> (i32, i32) {
    %c0_i32 = arith.constant 0 : i32
    %c0_i32_0 = arith.constant 0 : i32
    %c0_i32_1 = arith.constant 0 : i32
    return %c0_i32, %c0_i32_0 : i32, i32
  }
  func.func @transform_3(%arg0: i32) -> (i32, i32) {
    %c0_i32 = arith.constant 0 : i32
    %c0_i32_0 = arith.constant 0 : i32
    %c0_i32_1 = arith.constant 0 : i32
    return %c0_i32, %c0_i32_0 : i32, i32
  }
  func.func @transform_4(%arg0: i32) -> (i32, i32) {
    %c0_i32 = arith.constant 0 : i32
    %c0_i32_0 = arith.constant 0 : i32
    %c0_i32_1 = arith.constant 0 : i32
    return %c0_i32, %c0_i32_0 : i32, i32
  }
  func.func @transform_5(%arg0: i32) -> (i32, i32) {
    %c0_i32 = arith.constant 0 : i32
    %c0_i32_0 = arith.constant 0 : i32
    %c0_i32_1 = arith.constant 0 : i32
    return %c0_i32, %c0_i32_0 : i32, i32
  }
  func.func @transform_6(%arg0: i32) -> (i32, i32) {
    %c0_i32 = arith.constant 0 : i32
    %c0_i32_0 = arith.constant 0 : i32
    return %arg0, %c0_i32 : i32, i32
  }
}

module attributes {stable_mosaic.version = 11 : i64} {
  func.func @cross_modal_attention_kernel(%arg0: i32, %arg1: memref<8x128xf32, #tpu.memory_space<vmem>>, %arg2: memref<8x128xf32, #tpu.memory_space<vmem>>, %arg3: memref<128x128xbf16, #tpu.memory_space<vmem>>, %arg4: memref<128x256xbf16, #tpu.memory_space<vmem>>, %arg5: memref<256x128xbf16, #tpu.memory_space<vmem>>, %arg6: memref<8x256xf32, #tpu.memory_space<vmem>>, %arg7: memref<8x128xf32, #tpu.memory_space<vmem>>) attributes {dimension_semantics = [#tpu.dimension_semantics<parallel>], iteration_bounds = array<i64: 1>, scalar_prefetch = 0 : i64, scratch_operands = 0 : i64, tpu.core_type = #tpu.core_type<tc>, window_params = [{transform_indices = @transform_0, window_bounds = array<i64: 8, 128>}, {transform_indices = @transform_1, window_bounds = array<i64: 8, 128>}, {pipeline_mode = #tpu.pipeline_mode<synchronous>, transform_indices = @transform_2, window_bounds = array<i64: 128, 128>}, {pipeline_mode = #tpu.pipeline_mode<synchronous>, transform_indices = @transform_3, window_bounds = array<i64: 128, 256>}, {pipeline_mode = #tpu.pipeline_mode<synchronous>, transform_indices = @transform_4, window_bounds = array<i64: 256, 128>}, {pipeline_mode = #tpu.pipeline_mode<synchronous>, transform_indices = @transform_5, window_bounds = array<i64: 8, 256>}, {transform_indices = @transform_6, window_bounds = array<i64: 8, 128>}]} {
    %c0 = arith.constant 0 : index
    %c0_0 = arith.constant 0 : index
    %0 = vector.load %arg6[%c0, %c0_0] : memref<8x256xf32, #tpu.memory_space<vmem>>, vector<1x128xf32>
    %c1 = arith.constant 1 : index
    %c0_1 = arith.constant 0 : index
    %1 = vector.load %arg6[%c1, %c0_1] : memref<8x256xf32, #tpu.memory_space<vmem>>, vector<1x128xf32>
    %c2 = arith.constant 2 : index
    %c0_2 = arith.constant 0 : index
    %2 = vector.load %arg6[%c2, %c0_2] : memref<8x256xf32, #tpu.memory_space<vmem>>, vector<1x128xf32>
    %c3 = arith.constant 3 : index
    %c0_3 = arith.constant 0 : index
    %3 = vector.load %arg6[%c3, %c0_3] : memref<8x256xf32, #tpu.memory_space<vmem>>, vector<1x256xf32>
    %c4 = arith.constant 4 : index
    %c0_4 = arith.constant 0 : index
    %4 = vector.load %arg6[%c4, %c0_4] : memref<8x256xf32, #tpu.memory_space<vmem>>, vector<1x128xf32>
    %c5 = arith.constant 5 : index
    %c0_5 = arith.constant 0 : index
    %5 = vector.load %arg6[%c5, %c0_5] : memref<8x256xf32, #tpu.memory_space<vmem>>, vector<1x128xf32>
    %c6 = arith.constant 6 : index
    %c0_6 = arith.constant 0 : index
    %6 = vector.load %arg6[%c6, %c0_6] : memref<8x256xf32, #tpu.memory_space<vmem>>, vector<1x128xf32>
    %c0_7 = arith.constant 0 : index
    %c0_8 = arith.constant 0 : index
    %7 = vector.load %arg1[%c0_7, %c0_8] : memref<8x128xf32, #tpu.memory_space<vmem>>, vector<8x128xf32>
    %c0_9 = arith.constant 0 : index
    %c0_10 = arith.constant 0 : index
    %8 = vector.load %arg2[%c0_9, %c0_10] : memref<8x128xf32, #tpu.memory_space<vmem>>, vector<8x128xf32>
    %9 = arith.truncf %8 : vector<8x128xf32> to vector<8x128xbf16>
    %c0_11 = arith.constant 0 : index
    %c0_12 = arith.constant 0 : index
    %10 = vector.load %arg3[%c0_11, %c0_12] : memref<128x128xbf16, #tpu.memory_space<vmem>>, vector<128x128xbf16>
    %cst = arith.constant dense<0.000000e+00> : vector<8x128xf32>
    %11 = tpu.matmul %9, %10, %cst {dimension_numbers = #tpu.dot_dimension_numbers<[1], [0], [0], [1], [0, 0, 1, 1], [], []>} : vector<8x128xbf16>, vector<128x128xbf16>, vector<8x128xf32> -> vector<8x128xf32>
    %12 = vector.broadcast %0 : vector<1x128xf32> to vector<8x128xf32>
    %13 = arith.addf %11, %12 : vector<8x128xf32>
    %14 = arith.addf %7, %13 : vector<8x128xf32>
    %cst_13 = arith.constant dense<0.000000e+00> : vector<8xf32>
    %15 = vector.multi_reduction <add>, %14, %cst_13 [1] : vector<8x128xf32> to vector<8xf32>
    %16 = vector.shape_cast %15 : vector<8xf32> to vector<8x1xf32>
    %cst_14 = arith.constant 1.280000e+02 : f32
    %17 = vector.broadcast %cst_14 : f32 to vector<8x1xf32>
    %18 = arith.divf %16, %17 : vector<8x1xf32>
    %19 = vector.broadcast %18 : vector<8x1xf32> to vector<8x128xf32>
    %20 = arith.subf %14, %19 : vector<8x128xf32>
    %21 = arith.mulf %20, %20 : vector<8x128xf32>
    %cst_15 = arith.constant dense<0.000000e+00> : vector<8xf32>
    %22 = vector.multi_reduction <add>, %21, %cst_15 [1] : vector<8x128xf32> to vector<8xf32>
    %23 = vector.shape_cast %22 : vector<8xf32> to vector<8x1xf32>
    %cst_16 = arith.constant 1.280000e+02 : f32
    %24 = vector.broadcast %cst_16 : f32 to vector<8x1xf32>
    %25 = arith.divf %23, %24 : vector<8x1xf32>
    %26 = vector.broadcast %18 : vector<8x1xf32> to vector<8x128xf32>
    %27 = arith.subf %14, %26 : vector<8x128xf32>
    %cst_17 = arith.constant 9.99999974E-6 : f32
    %28 = vector.broadcast %cst_17 : f32 to vector<8x1xf32>
    %29 = arith.addf %25, %28 : vector<8x1xf32>
    %30 = math.rsqrt %29 : vector<8x1xf32>
    %31 = vector.broadcast %30 : vector<8x1xf32> to vector<8x128xf32>
    %32 = arith.mulf %27, %31 : vector<8x128xf32>
    %33 = vector.broadcast %1 : vector<1x128xf32> to vector<8x128xf32>
    %34 = arith.mulf %32, %33 : vector<8x128xf32>
    %35 = vector.broadcast %2 : vector<1x128xf32> to vector<8x128xf32>
    %36 = arith.addf %34, %35 : vector<8x128xf32>
    %37 = arith.truncf %36 : vector<8x128xf32> to vector<8x128xbf16>
    %c0_18 = arith.constant 0 : index
    %c0_19 = arith.constant 0 : index
    %38 = vector.load %arg4[%c0_18, %c0_19] : memref<128x256xbf16, #tpu.memory_space<vmem>>, vector<128x256xbf16>
    %cst_20 = arith.constant dense<0.000000e+00> : vector<8x256xf32>
    %39 = tpu.matmul %37, %38, %cst_20 {dimension_numbers = #tpu.dot_dimension_numbers<[1], [0], [0], [1], [0, 0, 1, 1], [], []>} : vector<8x128xbf16>, vector<128x256xbf16>, vector<8x256xf32> -> vector<8x256xf32>
    %40 = vector.broadcast %3 : vector<1x256xf32> to vector<8x256xf32>
    %41 = arith.addf %39, %40 : vector<8x256xf32>
    %cst_21 = arith.constant 5.000000e-01 : f32
    %42 = vector.broadcast %cst_21 : f32 to vector<8x256xf32>
    %43 = arith.mulf %42, %41 : vector<8x256xf32>
    %cst_22 = arith.constant 0.707106769 : f32
    %44 = vector.broadcast %cst_22 : f32 to vector<8x256xf32>
    %45 = arith.mulf %41, %44 : vector<8x256xf32>
    %46 = math.erf %45 : vector<8x256xf32>
    %cst_23 = arith.constant 1.000000e+00 : f32
    %47 = vector.broadcast %cst_23 : f32 to vector<8x256xf32>
    %48 = arith.addf %47, %46 : vector<8x256xf32>
    %49 = arith.mulf %43, %48 : vector<8x256xf32>
    %50 = arith.truncf %49 : vector<8x256xf32> to vector<8x256xbf16>
    %c0_24 = arith.constant 0 : index
    %c0_25 = arith.constant 0 : index
    %51 = vector.load %arg5[%c0_24, %c0_25] : memref<256x128xbf16, #tpu.memory_space<vmem>>, vector<256x128xbf16>
    %cst_26 = arith.constant dense<0.000000e+00> : vector<8x128xf32>
    %52 = tpu.matmul %50, %51, %cst_26 {dimension_numbers = #tpu.dot_dimension_numbers<[1], [0], [0], [1], [0, 0, 1, 1], [], []>} : vector<8x256xbf16>, vector<256x128xbf16>, vector<8x128xf32> -> vector<8x128xf32>
    %53 = vector.broadcast %4 : vector<1x128xf32> to vector<8x128xf32>
    %54 = arith.addf %52, %53 : vector<8x128xf32>
    %55 = arith.addf %36, %54 : vector<8x128xf32>
    %cst_27 = arith.constant dense<0.000000e+00> : vector<8xf32>
    %56 = vector.multi_reduction <add>, %55, %cst_27 [1] : vector<8x128xf32> to vector<8xf32>
    %57 = vector.shape_cast %56 : vector<8xf32> to vector<8x1xf32>
    %cst_28 = arith.constant 1.280000e+02 : f32
    %58 = vector.broadcast %cst_28 : f32 to vector<8x1xf32>
    %59 = arith.divf %57, %58 : vector<8x1xf32>
    %60 = vector.broadcast %59 : vector<8x1xf32> to vector<8x128xf32>
    %61 = arith.subf %55, %60 : vector<8x128xf32>
    %62 = arith.mulf %61, %61 : vector<8x128xf32>
    %cst_29 = arith.constant dense<0.000000e+00> : vector<8xf32>
    %63 = vector.multi_reduction <add>, %62, %cst_29 [1] : vector<8x128xf32> to vector<8xf32>
    %64 = vector.shape_cast %63 : vector<8xf32> to vector<8x1xf32>
    %cst_30 = arith.constant 1.280000e+02 : f32
    %65 = vector.broadcast %cst_30 : f32 to vector<8x1xf32>
    %66 = arith.divf %64, %65 : vector<8x1xf32>
    %67 = vector.broadcast %59 : vector<8x1xf32> to vector<8x128xf32>
    %68 = arith.subf %55, %67 : vector<8x128xf32>
    %cst_31 = arith.constant 9.99999974E-6 : f32
    %69 = vector.broadcast %cst_31 : f32 to vector<8x1xf32>
    %70 = arith.addf %66, %69 : vector<8x1xf32>
    %71 = math.rsqrt %70 : vector<8x1xf32>
    %72 = vector.broadcast %71 : vector<8x1xf32> to vector<8x128xf32>
    %73 = arith.mulf %68, %72 : vector<8x128xf32>
    %74 = vector.broadcast %5 : vector<1x128xf32> to vector<8x128xf32>
    %75 = arith.mulf %73, %74 : vector<8x128xf32>
    %76 = vector.broadcast %6 : vector<1x128xf32> to vector<8x128xf32>
    %77 = arith.addf %75, %76 : vector<8x128xf32>
    %c0_32 = arith.constant 0 : index
    %c0_33 = arith.constant 0 : index
    %78 = vector.load %arg7[%c0_32, %c0_33] : memref<8x128xf32, #tpu.memory_space<vmem>>, vector<8x128xf32>
    tpu.vector_store %arg7[%c0_32, %c0_33], %77 {strides = array<i32>} : memref<8x128xf32, #tpu.memory_space<vmem>>, vector<8x128xf32>,
    return
  }
  func.func @transform_0(%arg0: i32) -> (i32, i32) {
    %c0_i32 = arith.constant 0 : i32
    %c0_i32_0 = arith.constant 0 : i32
    return %arg0, %c0_i32 : i32, i32
  }
  func.func @transform_1(%arg0: i32) -> (i32, i32) {
    %c0_i32 = arith.constant 0 : i32
    %c0_i32_0 = arith.constant 0 : i32
    return %arg0, %c0_i32 : i32, i32
  }
  func.func @transform_2(%arg0: i32) -> (i32, i32) {
    %c0_i32 = arith.constant 0 : i32
    %c0_i32_0 = arith.constant 0 : i32
    %c0_i32_1 = arith.constant 0 : i32
    return %c0_i32, %c0_i32_0 : i32, i32
  }
  func.func @transform_3(%arg0: i32) -> (i32, i32) {
    %c0_i32 = arith.constant 0 : i32
    %c0_i32_0 = arith.constant 0 : i32
    %c0_i32_1 = arith.constant 0 : i32
    return %c0_i32, %c0_i32_0 : i32, i32
  }
  func.func @transform_4(%arg0: i32) -> (i32, i32) {
    %c0_i32 = arith.constant 0 : i32
    %c0_i32_0 = arith.constant 0 : i32
    %c0_i32_1 = arith.constant 0 : i32
    return %c0_i32, %c0_i32_0 : i32, i32
  }
  func.func @transform_5(%arg0: i32) -> (i32, i32) {
    %c0_i32 = arith.constant 0 : i32
    %c0_i32_0 = arith.constant 0 : i32
    %c0_i32_1 = arith.constant 0 : i32
    return %c0_i32, %c0_i32_0 : i32, i32
  }
  func.func @transform_6(%arg0: i32) -> (i32, i32) {
    %c0_i32 = arith.constant 0 : i32
    %c0_i32_0 = arith.constant 0 : i32
    return %arg0, %c0_i32 : i32, i32
  }
}

</mosaic_0001>

<bundles_post_ra>
// kernel: tpu_custom_call.1
= control target key start
LH: loop header
LB: loop body
LE: loop exit
PB: predicated region body
PF: predicated region fallthrough
CT: control target
= control target key end

     0   :  { %11 = vsyncpa [#allocation3], 0  ;;  %s1162_s0 = inlined_call_operand.hbm [shape: f32[8,128], index: 0, kind: input, shape index: {}]   ;;  %s1163_s1 = inlined_call_operand.hbm [shape: f32[8,128], index: 1, kind: input, shape index: {}]   ;;  %s1164_s2 = inlined_call_operand.hbm [shape: bf16[128,128], index: 2, kind: input, shape index: {}]   ;;  %s1165_s3 = inlined_call_operand.hbm [shape: bf16[128,256], index: 3, kind: input, shape index: {}]   ;;  %s1166_s4 = inlined_call_operand.hbm [shape: bf16[256,128], index: 4, kind: input, shape index: {}]   ;;  %s1167_s5 = inlined_call_operand.hbm [shape: f32[8,256], index: 5, kind: input, shape index: {}]   ;;  %s1168_s6 = inlined_call_operand.hbm [shape: f32[8,128], index: 6, kind: output, shape index: {}]  }
   0x1   :  { %12 = vsyncpa [#allocation6], 0 }
   0x2   :  { %13 = vsyncpa [#allocation9], 0 }
   0x3   :  { %14 = vsyncpa [#allocation12], 0  ;;  %s32_s23 = sshll.u32 %s1163_s1, 4  ;;  %s33_s23 = int_to_ptr.hbm [resolvable:$true] %s32_s23 }
   0x4   :  { %15 = vsyncpa [#allocation4], 0  ;;  %s1048_s24 = smov [#allocation5]   ;;  %s55_s28 = sshll.u32 %s1165_s3, 4  ;;  %s56_s28 = int_to_ptr.hbm [resolvable:$true] %s55_s28 }
   0x5   :  { %s34_s25 = sshll.u32 %s1048_s24, 4  ;;  %s1049_s29 = smov [#allocation8]   ;;  %s35_s25 = int_to_ptr.vmem [resolvable:$true] %s34_s25 }
   0x6   :  { %37 = dma.hbm_to_vmem [thread:$0]  %s33_s23, 128, %s35_s25, [#allocation6]  }
   0x7   :  { %s57_s30 = sshll.u32 %s1049_s29, 4  ;;  %s1050_s7 = smov 128   ;;  %s58_s30 = int_to_ptr.vmem [resolvable:$true] %s57_s30 }
   0x8   :  { %s1051_s8 = smov 8   ;;  %s21_s1 = sshll.u32 %s1162_s0, 4  ;;  %s22_s1 = int_to_ptr.hbm [resolvable:$true] %s21_s1 }
   0x9   :  { %63 = dma.hbm_to_vmem [thread:$0]  %s56_s28, 2048, %s58_s30, [#allocation9], %s1050_s7, %s1050_s7, %s1051_s8  }
   0xa   :  { %s1052_s11 = smov [#allocation2]   ;;  %s42_s3 = sshll.u32 %s1164_s2, 4  ;;  %s43_s3 = int_to_ptr.hbm [resolvable:$true] %s42_s3 }
   0xb   :  { %s23_s12 = sshll.u32 %s1052_s11, 4  ;;  %s1053_s15 = smov [#allocation7]   ;;  %s24_s12 = int_to_ptr.vmem [resolvable:$true] %s23_s12 }
   0xc   :  { %26 = dma.hbm_to_vmem [thread:$0]  %s22_s1, 128, %s24_s12, [#allocation3]  }
   0xd   :  { %s44_s16 = sshll.u32 %s1053_s15, 4  ;;  %s1054_s17 = smov 64   ;;  %s45_s16 = int_to_ptr.vmem [resolvable:$true] %s44_s16 }
   0xe   :  { %s1055_s18 = smov 4   ;;  %s68_s0 = sshll.u32 %s1166_s4, 4  ;;  %s69_s0 = int_to_ptr.hbm [resolvable:$true] %s68_s0 }
   0xf   :  { %50 = dma.hbm_to_vmem [thread:$0]  %s43_s3, 1024, %s45_s16, [#allocation6], %s1054_s17, %s1054_s17, %s1055_s18  }
  0x10   :  { %s1056_s21 = smov [#allocation10]   ;;  %s82_s2 = sshll.u32 %s1167_s5, 4  ;;  %s83_s2 = int_to_ptr.hbm [resolvable:$true] %s82_s2 }
  0x11   :  { %s70_s22 = sshll.u32 %s1056_s21, 4  ;;  %s1057_s25 = smov [#allocation11]   ;;  %s71_s22 = int_to_ptr.vmem [resolvable:$true] %s70_s22 }
  0x12   :  { %76 = dma.hbm_to_vmem [thread:$0]  %s69_s0, 2048, %s71_s22, [#allocation9], %s1054_s17, %s1054_s17, %s1055_s18  }
  0x13   :  { %s84_s26 = sshll.u32 %s1057_s25, 4  ;;  %s85_s26 = int_to_ptr.vmem [resolvable:$true] %s84_s26 }
  0x14   :  { %87 = dma.hbm_to_vmem [thread:$0]  %s83_s2, 256, %s85_s26, [#allocation12]  }
  0x15   :  { %1038 = dma.done.wait [#allocation3], 128  }
  0x16   :  { %1039 = vsyncadd [#allocation3], 4294967168 }
  0x17   :  { %1040 = dma.done.wait [#allocation6], 1152  }
  0x18   :  { %1041 = vsyncadd [#allocation6], 4294966144 }
  0x19   :  { %1042 = dma.done.wait [#allocation9], 4096  }
  0x1a   :  { %1043 = vsyncadd [#allocation9], 4294963200 }
  0x1b   :  { %1044 = dma.done.wait [#allocation12], 256  }
  0x1c   :  { %1045 = vsyncadd [#allocation12], 4294967040  ;;  %v815_v0 = vld [vmem:[#allocation7 + $0x38] sm:$0xff]  ;;  %v814_v1 = vld [vmem:[#allocation7 + $0x30] sm:$0xff]  ;;  %v1058_v16 = vmov 128.0   ;;  %s1059_s4 = smov [#allocation13]  }
  0x1d   :  { %187 = vmatpush.bf16.msra.mxu0 %v815_v0  ;;  %v813_v2 = vld [vmem:[#allocation7 + $0x28] sm:$0xff]  ;;  %v812_v3 = vld [vmem:[#allocation7 + $0x20] sm:$0xff]  ;;  %v811_v4 = vld [vmem:[#allocation7 + $0x18] sm:$0xff]  ;;  %860 = vrcp.f32 %v1058_v16  ;;  %s631_s5 = sshll.u32 %s1059_s4, 4  ;;  %s633_s29 = sshll.u32 %s1168_s6, 4  ;;  %s632_s5 = int_to_ptr.vmem [resolvable:$true] %s631_s5  ;;  %s634_s29 = int_to_ptr.hbm [resolvable:$true] %s633_s29 }
  0x1e   :  { %v810_v5 = vld [vmem:[#allocation7 + $0x10] sm:$0xff]  ;;  %v809_v6 = vld [vmem:[#allocation7 + $0x8] sm:$0xff]  ;;  %v808_v7 = vld [vmem:[#allocation7] sm:$0xff] }
  0x1f   :  { %v121_v8 = vld [vmem:[#allocation5] sm:$0xff]  ;;  %v112_v10 = vld [vmem:[#allocation11] ss:$0 sm:$0xff]  ;;  %v120_v12 = vld [vmem:[#allocation2] sm:$0xff] }
  0x20   :  { %v122_v9 = vpack.c.bf16 %v121_v8, %v121_v8  ;;  %v736_v17 = vld [vmem:[#allocation8 + $0x70] sm:$0xf]  ;;  %v831_v18 = vld [vmem:[#allocation8 + $0x74] sm:$0xf0]  ;;  %v830_v19 = vld [vmem:[#allocation8 + $0x74] sm:$0xf] }
  0x21   :  { %188 = vmatpush.bf16.msra.mxu0 %v814_v1  ;;  %v737_v20 = vor.u32 %v831_v18, %v736_v17  ;;  %v738_v21 = vld [vmem:[#allocation8 + $0x78] sm:$0xf0]  ;;  %v728_v33 = vld [vmem:[#allocation8 + $0x60] sm:$0xf]  ;;  %v829_v34 = vld [vmem:[#allocation8 + $0x64] sm:$0xf0] }
  0x22   :  { %v741_v22 = vor.u32 %v830_v19, %v738_v21  ;;  %v828_v35 = vld [vmem:[#allocation8 + $0x64] sm:$0xf]  ;;  %v729_v36 = vor.u32 %v829_v34, %v728_v33  ;;  %v730_v37 = vld [vmem:[#allocation8 + $0x68] sm:$0xf0]  ;;  %v720_v39 = vld [vmem:[#allocation8 + $0x50] sm:$0xf] }
  0x23   :  { %332 = vmatpush.bf16.msra.mxu1 %v737_v20  ;;  %v861_v23 = vpop.eup %860  ;;  %v733_v38 = vor.u32 %v828_v35, %v730_v37  ;;  %v827_v40 = vld [vmem:[#allocation8 + $0x54] sm:$0xf0]  ;;  %v826_v41 = vld [vmem:[#allocation8 + $0x54] sm:$0xf]  ;;  %v722_v43 = vld [vmem:[#allocation8 + $0x58] sm:$0xf0] }
  0x24   :  { %345 = vmatpush.bf16.msra.mxu2 %v741_v22  ;;  %v204_v24 = vmul.f32 128.0, %v861_v23  ;;  %vm208_vm0 = vweird.f32 %v861_v23  ;;  %v721_v42 = vor.u32 %v827_v40, %v720_v39  ;;  %v725_v44 = vor.u32 %v826_v41, %v722_v43  ;;  %v712_v45 = vld [vmem:[#allocation8 + $0x40] sm:$0xf]  ;;  %v825_v46 = vld [vmem:[#allocation8 + $0x44] sm:$0xf0]  ;;  %v847_v33 = vld [vmem:[#allocation10 + $0x78] sm:$0xff] }
  0x25   :  { %189 = vmatpush.bf16.msra.mxu0 %v813_v2  ;;  %v824_v47 = vld [vmem:[#allocation8 + $0x44] sm:$0xf]  ;;  %v713_v48 = vor.u32 %v825_v46, %v712_v45  ;;  %v714_v49 = vld [vmem:[#allocation8 + $0x48] sm:$0xf0]  ;;  %v704_v51 = vld [vmem:[#allocation8 + $0x30] sm:$0xf] }
  0x26   :  { %v205_v25 = vsub.f32 1.0, %v204_v24  ;;  %v717_v50 = vor.u32 %v824_v47, %v714_v49  ;;  %v823_v52 = vld [vmem:[#allocation8 + $0x34] sm:$0xf0]  ;;  %v822_v53 = vld [vmem:[#allocation8 + $0x34] sm:$0xf]  ;;  %v837_v35 = vld [vmem:[#allocation10 + $0x28] sm:$0xff] }
  0x27   :  { %333 = vmatpush.bf16.msra.mxu1 %v729_v36  ;;  %v705_v54 = vor.u32 %v823_v52, %v704_v51  ;;  %v706_v55 = vld [vmem:[#allocation8 + $0x38] sm:$0xf0]  ;;  %v696_v57 = vld [vmem:[#allocation8 + $0x20] sm:$0xf]  ;;  %v821_v58 = vld [vmem:[#allocation8 + $0x24] sm:$0xf0] }
  0x28   :  { %v206_v26 = vmul.f32 %v861_v23, %v205_v25  ;;  %346 = vmatpush.bf16.msra.mxu2 %v733_v38  ;;  %v709_v56 = vor.u32 %v822_v53, %v706_v55  ;;  %v820_v59 = vld [vmem:[#allocation8 + $0x24] sm:$0xf]  ;;  %v697_v60 = vor.u32 %v821_v58, %v696_v57  ;;  %v698_v61 = vld [vmem:[#allocation8 + $0x28] sm:$0xf0]  ;;  %v688_v63 = vld [vmem:[#allocation8 + $0x10] sm:$0xf] }
  0x29   :  { %190 = vmatpush.bf16.msra.mxu0 %v812_v3  ;;  %v701_v62 = vor.u32 %v820_v59, %v698_v61  ;;  %v819_v0 = vld [vmem:[#allocation8 + $0x14] sm:$0xf0]  ;;  %v818_v1 = vld [vmem:[#allocation8 + $0x14] sm:$0xf]  ;;  %v690_v3 = vld [vmem:[#allocation8 + $0x18] sm:$0xf0] }
  0x2a   :  { %v207_v27 = vadd.f32 %v861_v23, %v206_v26  ;;  %v689_v2 = vor.u32 %v819_v0, %v688_v63  ;;  %v682_v8 = vld [vmem:[#allocation8 + $0x8] sm:$0xf0]  ;;  %v113_v20 = vld [vmem:[#allocation11 + $0x1] ss:$0 sm:$0xff]  ;;  %v846_v36 = vld [vmem:[#allocation10 + $0x70] sm:$0xff] }
  0x2b   :  { %334 = vmatpush.bf16.msra.mxu1 %v721_v42  ;;  %v836_v39 = vld [vmem:[#allocation10 + $0x20] sm:$0xff]  ;;  %v845_v42 = vld [vmem:[#allocation10 + $0x68] sm:$0xff]  ;;  %v835_v46 = vld [vmem:[#allocation10 + $0x18] sm:$0xff] }
  0x2c   :  { %v1113_v28 = vsel %vm208_vm0, %v861_v23, %v207_v27  ;;  %347 = vmatpush.bf16.msra.mxu2 %v725_v44  ;;  %v114_v23 = vld [vmem:[#allocation11 + $0x2] ss:$0 sm:$0xff]  ;;  %v839_v27 = vld [vmem:[#allocation10 + $0x38] sm:$0xff]  ;;  %v834_v53 = vld [vmem:[#allocation10 + $0x10] sm:$0xff] }
  0x2d   :  { %191 = vmatpush.bf16.msra.mxu0 %v811_v4  ;;  %v680_v4 = vld [vmem:[#allocation8] sm:$0xf]  ;;  %576 = vmatpush.bf16.msra.mxu3 %v839_v27  ;;  %v843_v58 = vld [vmem:[#allocation10 + $0x58] sm:$0xff]  ;;  %v833_v63 = vld [vmem:[#allocation10 + $0x8] sm:$0xff] }
  0x2e   :  { %v844_v49 = vld [vmem:[#allocation10 + $0x60] sm:$0xff] }
  0x2f   :  { %335 = vmatpush.bf16.msra.mxu1 %v713_v48 }
  0x30   :  { %348 = vmatpush.bf16.msra.mxu2 %v717_v50 }
  0x31   :  { %192 = vmatpush.bf16.msra.mxu0 %v810_v5  ;;  %v817_v5 = vld [vmem:[#allocation8 + $0x4] sm:$0xf0] }
  0x33   :  { %336 = vmatpush.bf16.msra.mxu1 %v705_v54 }
  0x34   :  { %349 = vmatpush.bf16.msra.mxu2 %v709_v56 }
  0x35   :  { %193 = vmatpush.bf16.msra.mxu0 %v809_v6  ;;  %v693_v6 = vor.u32 %v818_v1, %v690_v3  ;;  %v842_v3 = vld [vmem:[#allocation10 + $0x50] sm:$0xff] }
  0x37   :  { %337 = vmatpush.bf16.msra.mxu1 %v697_v60 }
  0x38   :  { %350 = vmatpush.bf16.msra.mxu2 %v701_v62 }
  0x39   :  { %194 = vmatpush.bf16.msra.mxu0 %v808_v7  ;;  %v816_v7 = vld [vmem:[#allocation8 + $0x4] sm:$0xf] }
  0x3b   :  { %338 = vmatpush.bf16.msra.mxu1 %v689_v2 }
  0x3c   :  { %195 = vmatmul.bf16.vlgmr.msra.gmra.mxu0 %v122_v9  ;;  %v681_v9 = vor.u32 %v817_v5, %v680_v4  ;;  %351 = vmatpush.bf16.msra.mxu2 %v693_v6 }
  0x3d   :  { %589 = vmatpush.bf16.msrb.mxu0 %v847_v33 }
  0x3f   :  { %339 = vmatpush.bf16.msra.mxu1 %v681_v9  ;;  %v841_v9 = vld [vmem:[#allocation10 + $0x48] sm:$0xff] }
  0x41   :  { %590 = vmatpush.bf16.msrb.mxu0 %v846_v36 }
  0x45   :  { %591 = vmatpush.bf16.msrb.mxu0 %v845_v42 }
  0x49   :  { %592 = vmatpush.bf16.msrb.mxu0 %v844_v49 }
  0x4d   :  { %593 = vmatpush.bf16.msrb.mxu0 %v843_v58 }
  0x51   :  { %594 = vmatpush.bf16.msrb.mxu0 %v842_v3 }
  0x55   :  { %595 = vmatpush.bf16.msrb.mxu0 %v841_v9 }
  0xb9   :  { %v196_v11 = vpop.f32.mrf.mxu0 }
  0xba   :  { %v197_v13 = vadd.f32 %v196_v11, %v112_v10  ;;  %v685_v10 = vor.u32 %v816_v7, %v682_v8  ;;  %v832_v8 = vld [vmem:[#allocation10] sm:$0xff] }
  0xbc   :  { %v200_v14 = vadd.f32 %v197_v13, %v120_v12  ;;  %352 = vmatpush.bf16.msra.mxu2 %v685_v10 }
  0xbe   :  { %201 = vadd.xlane.f32.xlu0 %v200_v14 }
  0xc1   :  { %v198_v15 = vpop.f32.mrf.mxu0 }
 0x131   :  { %v202_v29 = vpop.xlane.xlu0 %201 }
 0x132   :  { %v210_v30 = vmul.f32 %v1113_v28, %v202_v29  ;;  %v116_v29 = vld [vmem:[#allocation11 + $0x3] ss:$8 sm:$0x3] }
 0x133   :  { %v249_v38 = vperm.slane %v116_v29, 1 }
 0x134   :  { %v1116_v31 = vsub.f32 %v200_v14, %v210_v30  ;;  %v838_v30 = vld [vmem:[#allocation10 + $0x30] sm:$0xff] }
 0x135   :  { %577 = vmatpush.bf16.msra.mxu3 %v838_v30 }
 0x136   :  { %v212_v32 = vmul.f32 %v1116_v31, %v1116_v31 }
 0x138   :  { %213 = vadd.xlane.f32.xlu0 %v212_v32  ;;  %v248_v32 = vperm.slane %v116_v29, 0 }
 0x139   :  { %578 = vmatpush.bf16.msra.mxu3 %v837_v35 }
 0x13d   :  { %579 = vmatpush.bf16.msra.mxu3 %v836_v39 }
 0x141   :  { %580 = vmatpush.bf16.msra.mxu3 %v835_v46 }
 0x145   :  { %581 = vmatpush.bf16.msra.mxu3 %v834_v53 }
 0x149   :  { %582 = vmatpush.bf16.msra.mxu3 %v833_v63 }
 0x14d   :  { %583 = vmatpush.bf16.msra.mxu3 %v832_v8 }
 0x1ab   :  { %v214_v11 = vpop.xlane.xlu0 %213 }
 0x1ac   :  { %v215_v12 = vmul.f32 %v214_v11, %v1113_v28 }
 0x1ae   :  { %v216_v13 = vadd.f32 1e-05, %v215_v12 }
 0x1b0   :  { %862 = vrsqrt.f32 %v216_v13  ;;  %vm223_vm2 = vweird.f32 %v216_v13 }
 0x1b6   :  { %v863_v14 = vpop.eup %862 }
 0x1b7   :  { %v218_v15 = vmul.f32 %v863_v14, %v216_v13  ;;  %vm224_vm1 = vweird.f32 %v863_v14 }
 0x1b8   :  { %vm225_vm3 = vmor %vm223_vm2, %vm224_vm1 }
 0x1b9   :  { %v219_v16 = vmul.f32 %v863_v14, %v218_v15 }
 0x1bb   :  { %v220_v17 = vmul.f32 0.5, %v219_v16 }
 0x1bd   :  { %v221_v18 = vsub.f32 1.5, %v220_v17 }
 0x1bf   :  { %v222_v19 = vmul.f32 %v863_v14, %v221_v18 }
 0x1c1   :  { %v226_v21 = vsel %vm225_vm3, %v863_v14, %v222_v19  ;;  %v840_v19 = vld [vmem:[#allocation10 + $0x40] sm:$0xff] }
 0x1c2   :  { %v227_v22 = vmul.f32 %v226_v21, %v1116_v31  ;;  %596 = vmatpush.bf16.msrb.mxu0 %v840_v19 }
 0x1c4   :  { %v228_v24 = vmul.f32 %v227_v22, %v113_v20 }
 0x1c6   :  { %v1122_v25 = vadd.f32 %v228_v24, %v114_v23 }
 0x1c8   :  { %v230_v26 = vpack.c.bf16 %v1122_v25, %v1122_v25 }
 0x1ca   :  { %340 = vmatmul.bf16.vlgmr.msra.gmra.mxu1 %v230_v26  ;;  %353 = vmatmul.bf16.vlgmr.msra.gmra.mxu2 %v230_v26 }
 0x247   :  { %v341_v34 = vpop.f32.mrf.mxu1 }
 0x248   :  { %v1126_v31 = vadd.f32 %v341_v34, %v248_v32 }
 0x24a   :  { %v1129_v37 = vmul.f32 0.70710677, %v1126_v31  ;;  %v358_v63 = vmul.f32 0.5, %v1126_v31 }
 0x24c   :  { %v362_v40 = vmul.f32 %v1129_v37, %v1129_v37 }
 0x24d   :  { %v354_v41 = vpop.f32.mrf.mxu2 }
 0x24e   :  { %v1133_v43 = vmin.f32 %v362_v40, 16.0  ;;  %v1135_v44 = vadd.f32 %v354_v41, %v249_v38 }
 0x24f   :  { %v343_v45 = vpop.f32.mrf.mxu1 }
 0x250   :  { %v364_v47 = vmul.f32 2.1237322e-06, %v1133_v43  ;;  %v1139_v48 = vmul.f32 0.70710677, %v1135_v44  ;;  %v375_v50 = vmul.f32 3.8918573e-05, %v1133_v43 }
 0x252   :  { %v365_v51 = vadd.f32 0.00028619796, %v364_v47  ;;  %v402_v52 = vmul.f32 %v1139_v48, %v1139_v48  ;;  %v376_v54 = vadd.f32 0.001143296, %v375_v50 }
 0x254   :  { %v366_v55 = vmul.f32 %v365_v51, %v1133_v43  ;;  %v403_v56 = vmin.f32 %v402_v52, 16.0  ;;  %v377_v59 = vmul.f32 %v376_v54, %v1133_v43 }
 0x255   :  { %v356_v57 = vpop.f32.mrf.mxu2 }
 0x256   :  { %v404_v60 = vmul.f32 2.1237322e-06, %v403_v56  ;;  %v415_v61 = vmul.f32 3.8918573e-05, %v403_v56  ;;  %v367_v62 = vadd.f32 0.0036580483, %v366_v55 }
 0x257   :  { %v378_v0 = vadd.f32 0.014752088, %v377_v59 }
 0x258   :  { %v405_v1 = vadd.f32 0.00028619796, %v404_v60  ;;  %v416_v2 = vadd.f32 0.001143296, %v415_v61  ;;  %v368_v7 = vmul.f32 %v367_v62, %v1133_v43 }
 0x259   :  { %v379_v4 = vmul.f32 %v378_v0, %v1133_v43 }
 0x25a   :  { %v406_v5 = vmul.f32 %v405_v1, %v403_v56  ;;  %v417_v6 = vmul.f32 %v416_v2, %v403_v56  ;;  %v369_v15 = vadd.f32 0.05243302, %v368_v7 }
 0x25b   :  { %v380_v10 = vadd.f32 0.112945676, %v379_v4 }
 0x25c   :  { %v407_v11 = vadd.f32 0.0036580483, %v406_v5  ;;  %v418_v12 = vadd.f32 0.014752088, %v417_v6  ;;  %v370_v22 = vmul.f32 %v369_v15, %v1133_v43  ;;  %v359_v6 = vmul.f32 0.5, %v1135_v44 }
 0x25d   :  { %v381_v13 = vmul.f32 %v380_v10, %v1133_v43  ;;  %v117_v10 = vld [vmem:[#allocation11 + $0x4] ss:$0 sm:$0xff] }
 0x25e   :  { %v419_v14 = vmul.f32 %v418_v12, %v403_v56  ;;  %v408_v17 = vmul.f32 %v407_v11, %v403_v56  ;;  %v371_v29 = vadd.f32 0.18741608, %v370_v22 }
 0x25f   :  { %v382_v16 = vadd.f32 0.4994258, %v381_v13 }
 0x260   :  { %v420_v18 = vadd.f32 0.112945676, %v419_v14  ;;  %v409_v24 = vadd.f32 0.05243302, %v408_v17  ;;  %v372_v34 = vmul.f32 %v371_v29, %v1133_v43 }
 0x261   :  { %v383_v20 = vmul.f32 %v382_v16, %v1133_v43 }
 0x262   :  { %v421_v21 = vmul.f32 %v420_v18, %v403_v56  ;;  %v410_v30 = vmul.f32 %v409_v24, %v403_v56  ;;  %v373_v39 = vadd.f32 1.1283791, %v372_v34 }
 0x263   :  { %v384_v23 = vadd.f32 1.0, %v383_v20 }
 0x264   :  { %v422_v26 = vadd.f32 0.4994258, %v421_v21  ;;  %v411_v35 = vadd.f32 0.18741608, %v410_v30  ;;  %v374_v50 = vmul.f32 %v373_v39, %v1129_v37  ;;  %v118_v30 = vld [vmem:[#allocation11 + $0x5] ss:$0 sm:$0xff] }
 0x265   :  { %864 = vrcp.f32 %v384_v23  ;;  %v396_v40 = vand.u32 2147483648, %v384_v23  ;;  %v394_v46 = vand.u32 2147483647, %v384_v23  ;;  %vm390_vm5 = vweird.f32 %v384_v23 }
 0x266   :  { %v423_v27 = vmul.f32 %v422_v26, %v403_v56  ;;  %v412_v42 = vmul.f32 %v411_v35, %v403_v56 }
 0x267   :  { %v397_v52 = vor.u32 1.1754944e-38, %v396_v40  ;;  %vm395_vm7 = vcmp.eq.f32.partialorder %v394_v46, 8.507059e+37 }
 0x268   :  { %v424_v32 = vadd.f32 1.0, %v423_v27  ;;  %v413_v53 = vadd.f32 1.1283791, %v412_v42 }
 0x26a   :  { %866 = vrcp.f32 %v424_v32  ;;  %v436_v43 = vand.u32 2147483648, %v424_v32  ;;  %v434_v57 = vand.u32 2147483647, %v424_v32  ;;  %vm430_vm9 = vweird.f32 %v424_v32 }
 0x26b   :  { %v865_v33 = vpop.eup %864  ;;  %v414_v62 = vmul.f32 %v413_v53, %v1139_v48 }
 0x26c   :  { %v386_v36 = vmul.f32 %v865_v33, %v384_v23  ;;  %vm391_vm4 = vweird.f32 %v865_v33  ;;  %v437_v60 = vor.u32 1.1754944e-38, %v436_v43  ;;  %vm435_vm11 = vcmp.eq.f32.partialorder %v434_v57, 8.507059e+37 }
 0x26d   :  { %vm392_vm6 = vmor %vm390_vm5, %vm391_vm4 }
 0x26e   :  { %v387_v38 = vsub.f32 1.0, %v386_v36 }
 0x270   :  { %v867_v41 = vpop.eup %866  ;;  %v388_v45 = vmul.f32 %v865_v33, %v387_v38 }
 0x271   :  { %v426_v47 = vmul.f32 %v867_v41, %v424_v32  ;;  %vm431_vm8 = vweird.f32 %v867_v41 }
 0x272   :  { %v389_v49 = vadd.f32 %v865_v33, %v388_v45  ;;  %vm432_vm10 = vmor %vm430_vm9, %vm431_vm8 }
 0x273   :  { %v427_v51 = vsub.f32 1.0, %v426_v47 }
 0x274   :  { %v393_v54 = vsel %vm392_vm6, %v865_v33, %v389_v49  ;;  %v119_v33 = vld [vmem:[#allocation11 + $0x6] ss:$0 sm:$0xff] }
 0x275   :  { %v428_v55 = vmul.f32 %v867_v41, %v427_v51  ;;  %v398_v58 = vsel %vm395_vm7, %v397_v52, %v393_v54 }
 0x276   :  { %v399_v56 = vmul.f32 %v398_v58, %v374_v50 }
 0x277   :  { %v429_v59 = vadd.f32 %v867_v41, %v428_v55 }
 0x278   :  { %v742_v61 = vclamps-f32 %v399_v56, 1.0 }
 0x279   :  { %v433_v37 = vsel %vm432_vm10, %v867_v41, %v429_v59 }
 0x27a   :  { %v438_v0 = vsel %vm435_vm11, %v437_v60, %v433_v37  ;;  %v442_v1 = vadd.f32 1.0, %v742_v61 }
 0x27b   :  { %v439_v2 = vmul.f32 %v438_v0, %v414_v62 }
 0x27c   :  { %v444_v3 = vmul.f32 %v442_v1, %v358_v63 }
 0x27d   :  { %v743_v4 = vclamps-f32 %v439_v2, 1.0 }
 0x27e   :  { %v446_v5 = vpack.c.bf16 %v444_v3, %v444_v3 }
 0x27f   :  { %v443_v7 = vadd.f32 1.0, %v743_v4 }
 0x280   :  { %584 = vmatmul.bf16.vlgmr.msra.gmra.mxu3 %v446_v5 }
 0x281   :  { %v445_v8 = vmul.f32 %v443_v7, %v359_v6 }
 0x283   :  { %v447_v9 = vpack.c.bf16 %v445_v8, %v445_v8 }
 0x285   :  { %597 = vmatmul.bf16.vlgmr.msrb.gmra.mxu0 %v447_v9 }
 0x302   :  { %v598_v11 = vpop.f32.mrf.mxu0 }
 0x303   :  { %v585_v48 = vpop.f32.mrf.mxu3 }
 0x304   :  { %v586_v12 = vadd.f32 %v585_v48, %v117_v10 }
 0x306   :  { %v599_v13 = vadd.f32 %v598_v11, %v586_v12 }
 0x308   :  { %v602_v31 = vadd.f32 %v599_v13, %v1122_v25 }
 0x30a   :  { %603 = vadd.xlane.f32.xlu1 %v602_v31  ;;  %v600_v14 = vpop.f32.mrf.mxu0 }
 0x30b   :  { %v587_v15 = vpop.f32.mrf.mxu3 }
 0x37d   :  { %v604_v16 = vpop.xlane.xlu1 %603 }
 0x37e   :  { %v605_v17 = vmul.f32 %v604_v16, %v1113_v28 }
 0x380   :  { %v606_v18 = vsub.f32 %v602_v31, %v605_v17 }
 0x382   :  { %v607_v44 = vmul.f32 %v606_v18, %v606_v18 }
 0x384   :  { %608 = vadd.xlane.f32.xlu1 %v607_v44 }
 0x3f7   :  { %v609_v19 = vpop.xlane.xlu1 %608 }
 0x3f8   :  { %v610_v20 = vmul.f32 %v609_v19, %v1113_v28 }
 0x3fa   :  { %v611_v21 = vadd.f32 1e-05, %v610_v20 }
 0x3fc   :  { %868 = vrsqrt.f32 %v611_v21  ;;  %vm618_vm13 = vweird.f32 %v611_v21 }
 0x402   :  { %v869_v22 = vpop.eup %868 }
 0x403   :  { %v613_v23 = vmul.f32 %v869_v22, %v611_v21  ;;  %vm619_vm12 = vweird.f32 %v869_v22 }
 0x404   :  { %vm620_vm14 = vmor %vm618_vm13, %vm619_vm12 }
 0x405   :  { %v614_v24 = vmul.f32 %v869_v22, %v613_v23 }
 0x407   :  { %v615_v26 = vmul.f32 0.5, %v614_v24 }
 0x409   :  { %v616_v27 = vsub.f32 1.5, %v615_v26 }
 0x40b   :  { %v617_v25 = vmul.f32 %v869_v22, %v616_v27 }
 0x40d   :  { %v621_v29 = vsel %vm620_vm14, %v869_v22, %v617_v25 }
 0x40e   :  { %v622_v32 = vmul.f32 %v621_v29, %v606_v18 }
 0x410   :  { %v623_v28 = vmul.f32 %v622_v32, %v118_v30 }
 0x412   :  { %v624_v34 = vadd.f32 %v623_v28, %v119_v33 }
 0x414   :  { %625 = vst [vmem:[#allocation13] sm:$0xff] %v624_v34 }
 0x415   :  { %636 = dma.vmem_to_hbm [thread:$0]  %s632_s5, 128, %s634_s29, [#allocation4]  }
 0x416   :  { %1046 = dma.done.wait [#allocation4], 128  }
 0x417   :  { %1047 = vsyncadd [#allocation4], 4294967168 }
 0x418   :  { %641 = vsyncpa [#allocation3], 1 }
 0x419   :  { %642 = vsyncpa [#allocation6], 1 }
 0x41a   :  { %643 = vsyncpa [#allocation9], 1 }
 0x41b   :  { %644 = vsyncpa [#allocation12], 1 }
 0x41c   :  { %645 = vsyncpa [#allocation4], 1 }

// kernel: tpu_custom_call.1
= control target key start
LH: loop header
LB: loop body
LE: loop exit
PB: predicated region body
PF: predicated region fallthrough
CT: control target
= control target key end

     0   :  { %11 = vsyncpa [#allocation3], 0  ;;  %s1162_s0 = inlined_call_operand.hbm [shape: f32[8,128], index: 0, kind: input, shape index: {}]   ;;  %s1163_s1 = inlined_call_operand.hbm [shape: f32[8,128], index: 1, kind: input, shape index: {}]   ;;  %s1164_s2 = inlined_call_operand.hbm [shape: bf16[128,128], index: 2, kind: input, shape index: {}]   ;;  %s1165_s3 = inlined_call_operand.hbm [shape: bf16[128,256], index: 3, kind: input, shape index: {}]   ;;  %s1166_s4 = inlined_call_operand.hbm [shape: bf16[256,128], index: 4, kind: input, shape index: {}]   ;;  %s1167_s5 = inlined_call_operand.hbm [shape: f32[8,256], index: 5, kind: input, shape index: {}]   ;;  %s1168_s6 = inlined_call_operand.hbm [shape: f32[8,128], index: 6, kind: output, shape index: {}]  }
   0x1   :  { %12 = vsyncpa [#allocation6], 0 }
   0x2   :  { %13 = vsyncpa [#allocation9], 0 }
   0x3   :  { %14 = vsyncpa [#allocation12], 0  ;;  %s32_s23 = sshll.u32 %s1163_s1, 4  ;;  %s33_s23 = int_to_ptr.hbm [resolvable:$true] %s32_s23 }
   0x4   :  { %15 = vsyncpa [#allocation4], 0  ;;  %s1048_s24 = smov [#allocation5]   ;;  %s55_s28 = sshll.u32 %s1165_s3, 4  ;;  %s56_s28 = int_to_ptr.hbm [resolvable:$true] %s55_s28 }
   0x5   :  { %s34_s25 = sshll.u32 %s1048_s24, 4  ;;  %s1049_s29 = smov [#allocation8]   ;;  %s35_s25 = int_to_ptr.vmem [resolvable:$true] %s34_s25 }
   0x6   :  { %37 = dma.hbm_to_vmem [thread:$0]  %s33_s23, 128, %s35_s25, [#allocation6]  }
   0x7   :  { %s57_s30 = sshll.u32 %s1049_s29, 4  ;;  %s1050_s7 = smov 128   ;;  %s58_s30 = int_to_ptr.vmem [resolvable:$true] %s57_s30 }
   0x8   :  { %s1051_s8 = smov 8   ;;  %s21_s1 = sshll.u32 %s1162_s0, 4  ;;  %s22_s1 = int_to_ptr.hbm [resolvable:$true] %s21_s1 }
   0x9   :  { %63 = dma.hbm_to_vmem [thread:$0]  %s56_s28, 2048, %s58_s30, [#allocation9], %s1050_s7, %s1050_s7, %s1051_s8  }
   0xa   :  { %s1052_s11 = smov [#allocation2]   ;;  %s42_s3 = sshll.u32 %s1164_s2, 4  ;;  %s43_s3 = int_to_ptr.hbm [resolvable:$true] %s42_s3 }
   0xb   :  { %s23_s12 = sshll.u32 %s1052_s11, 4  ;;  %s1053_s15 = smov [#allocation7]   ;;  %s24_s12 = int_to_ptr.vmem [resolvable:$true] %s23_s12 }
   0xc   :  { %26 = dma.hbm_to_vmem [thread:$0]  %s22_s1, 128, %s24_s12, [#allocation3]  }
   0xd   :  { %s44_s16 = sshll.u32 %s1053_s15, 4  ;;  %s1054_s17 = smov 64   ;;  %s45_s16 = int_to_ptr.vmem [resolvable:$true] %s44_s16 }
   0xe   :  { %s1055_s18 = smov 4   ;;  %s68_s0 = sshll.u32 %s1166_s4, 4  ;;  %s69_s0 = int_to_ptr.hbm [resolvable:$true] %s68_s0 }
   0xf   :  { %50 = dma.hbm_to_vmem [thread:$0]  %s43_s3, 1024, %s45_s16, [#allocation6], %s1054_s17, %s1054_s17, %s1055_s18  }
  0x10   :  { %s1056_s21 = smov [#allocation10]   ;;  %s82_s2 = sshll.u32 %s1167_s5, 4  ;;  %s83_s2 = int_to_ptr.hbm [resolvable:$true] %s82_s2 }
  0x11   :  { %s70_s22 = sshll.u32 %s1056_s21, 4  ;;  %s1057_s25 = smov [#allocation11]   ;;  %s71_s22 = int_to_ptr.vmem [resolvable:$true] %s70_s22 }
  0x12   :  { %76 = dma.hbm_to_vmem [thread:$0]  %s69_s0, 2048, %s71_s22, [#allocation9], %s1054_s17, %s1054_s17, %s1055_s18  }
  0x13   :  { %s84_s26 = sshll.u32 %s1057_s25, 4  ;;  %s85_s26 = int_to_ptr.vmem [resolvable:$true] %s84_s26 }
  0x14   :  { %87 = dma.hbm_to_vmem [thread:$0]  %s83_s2, 256, %s85_s26, [#allocation12]  }
  0x15   :  { %1038 = dma.done.wait [#allocation3], 128  }
  0x16   :  { %1039 = vsyncadd [#allocation3], 4294967168 }
  0x17   :  { %1040 = dma.done.wait [#allocation6], 1152  }
  0x18   :  { %1041 = vsyncadd [#allocation6], 4294966144 }
  0x19   :  { %1042 = dma.done.wait [#allocation9], 4096  }
  0x1a   :  { %1043 = vsyncadd [#allocation9], 4294963200 }
  0x1b   :  { %1044 = dma.done.wait [#allocation12], 256  }
  0x1c   :  { %1045 = vsyncadd [#allocation12], 4294967040  ;;  %v815_v0 = vld [vmem:[#allocation7 + $0x38] sm:$0xff]  ;;  %v814_v1 = vld [vmem:[#allocation7 + $0x30] sm:$0xff]  ;;  %v1058_v16 = vmov 128.0   ;;  %s1059_s4 = smov [#allocation13]  }
  0x1d   :  { %187 = vmatpush.bf16.msra.mxu0 %v815_v0  ;;  %v813_v2 = vld [vmem:[#allocation7 + $0x28] sm:$0xff]  ;;  %v812_v3 = vld [vmem:[#allocation7 + $0x20] sm:$0xff]  ;;  %v811_v4 = vld [vmem:[#allocation7 + $0x18] sm:$0xff]  ;;  %860 = vrcp.f32 %v1058_v16  ;;  %s631_s5 = sshll.u32 %s1059_s4, 4  ;;  %s633_s29 = sshll.u32 %s1168_s6, 4  ;;  %s632_s5 = int_to_ptr.vmem [resolvable:$true] %s631_s5  ;;  %s634_s29 = int_to_ptr.hbm [resolvable:$true] %s633_s29 }
  0x1e   :  { %v810_v5 = vld [vmem:[#allocation7 + $0x10] sm:$0xff]  ;;  %v809_v6 = vld [vmem:[#allocation7 + $0x8] sm:$0xff]  ;;  %v808_v7 = vld [vmem:[#allocation7] sm:$0xff] }
  0x1f   :  { %v121_v8 = vld [vmem:[#allocation5] sm:$0xff]  ;;  %v112_v10 = vld [vmem:[#allocation11] ss:$0 sm:$0xff]  ;;  %v120_v12 = vld [vmem:[#allocation2] sm:$0xff] }
  0x20   :  { %v122_v9 = vpack.c.bf16 %v121_v8, %v121_v8  ;;  %v736_v17 = vld [vmem:[#allocation8 + $0x70] sm:$0xf]  ;;  %v831_v18 = vld [vmem:[#allocation8 + $0x74] sm:$0xf0]  ;;  %v830_v19 = vld [vmem:[#allocation8 + $0x74] sm:$0xf] }
  0x21   :  { %188 = vmatpush.bf16.msra.mxu0 %v814_v1  ;;  %v737_v20 = vor.u32 %v831_v18, %v736_v17  ;;  %v738_v21 = vld [vmem:[#allocation8 + $0x78] sm:$0xf0]  ;;  %v728_v33 = vld [vmem:[#allocation8 + $0x60] sm:$0xf]  ;;  %v829_v34 = vld [vmem:[#allocation8 + $0x64] sm:$0xf0] }
  0x22   :  { %v741_v22 = vor.u32 %v830_v19, %v738_v21  ;;  %v828_v35 = vld [vmem:[#allocation8 + $0x64] sm:$0xf]  ;;  %v729_v36 = vor.u32 %v829_v34, %v728_v33  ;;  %v730_v37 = vld [vmem:[#allocation8 + $0x68] sm:$0xf0]  ;;  %v720_v39 = vld [vmem:[#allocation8 + $0x50] sm:$0xf] }
  0x23   :  { %332 = vmatpush.bf16.msra.mxu1 %v737_v20  ;;  %v861_v23 = vpop.eup %860  ;;  %v733_v38 = vor.u32 %v828_v35, %v730_v37  ;;  %v827_v40 = vld [vmem:[#allocation8 + $0x54] sm:$0xf0]  ;;  %v826_v41 = vld [vmem:[#allocation8 + $0x54] sm:$0xf]  ;;  %v722_v43 = vld [vmem:[#allocation8 + $0x58] sm:$0xf0] }
  0x24   :  { %345 = vmatpush.bf16.msra.mxu2 %v741_v22  ;;  %v204_v24 = vmul.f32 128.0, %v861_v23  ;;  %vm208_vm0 = vweird.f32 %v861_v23  ;;  %v721_v42 = vor.u32 %v827_v40, %v720_v39  ;;  %v725_v44 = vor.u32 %v826_v41, %v722_v43  ;;  %v712_v45 = vld [vmem:[#allocation8 + $0x40] sm:$0xf]  ;;  %v825_v46 = vld [vmem:[#allocation8 + $0x44] sm:$0xf0]  ;;  %v847_v33 = vld [vmem:[#allocation10 + $0x78] sm:$0xff] }
  0x25   :  { %189 = vmatpush.bf16.msra.mxu0 %v813_v2  ;;  %v824_v47 = vld [vmem:[#allocation8 + $0x44] sm:$0xf]  ;;  %v713_v48 = vor.u32 %v825_v46, %v712_v45  ;;  %v714_v49 = vld [vmem:[#allocation8 + $0x48] sm:$0xf0]  ;;  %v704_v51 = vld [vmem:[#allocation8 + $0x30] sm:$0xf] }
  0x26   :  { %v205_v25 = vsub.f32 1.0, %v204_v24  ;;  %v717_v50 = vor.u32 %v824_v47, %v714_v49  ;;  %v823_v52 = vld [vmem:[#allocation8 + $0x34] sm:$0xf0]  ;;  %v822_v53 = vld [vmem:[#allocation8 + $0x34] sm:$0xf]  ;;  %v837_v35 = vld [vmem:[#allocation10 + $0x28] sm:$0xff] }
  0x27   :  { %333 = vmatpush.bf16.msra.mxu1 %v729_v36  ;;  %v705_v54 = vor.u32 %v823_v52, %v704_v51  ;;  %v706_v55 = vld [vmem:[#allocation8 + $0x38] sm:$0xf0]  ;;  %v696_v57 = vld [vmem:[#allocation8 + $0x20] sm:$0xf]  ;;  %v821_v58 = vld [vmem:[#allocation8 + $0x24] sm:$0xf0] }
  0x28   :  { %v206_v26 = vmul.f32 %v861_v23, %v205_v25  ;;  %346 = vmatpush.bf16.msra.mxu2 %v733_v38  ;;  %v709_v56 = vor.u32 %v822_v53, %v706_v55  ;;  %v820_v59 = vld [vmem:[#allocation8 + $0x24] sm:$0xf]  ;;  %v697_v60 = vor.u32 %v821_v58, %v696_v57  ;;  %v698_v61 = vld [vmem:[#allocation8 + $0x28] sm:$0xf0]  ;;  %v688_v63 = vld [vmem:[#allocation8 + $0x10] sm:$0xf] }
  0x29   :  { %190 = vmatpush.bf16.msra.mxu0 %v812_v3  ;;  %v701_v62 = vor.u32 %v820_v59, %v698_v61  ;;  %v819_v0 = vld [vmem:[#allocation8 + $0x14] sm:$0xf0]  ;;  %v818_v1 = vld [vmem:[#allocation8 + $0x14] sm:$0xf]  ;;  %v690_v3 = vld [vmem:[#allocation8 + $0x18] sm:$0xf0] }
  0x2a   :  { %v207_v27 = vadd.f32 %v861_v23, %v206_v26  ;;  %v689_v2 = vor.u32 %v819_v0, %v688_v63  ;;  %v682_v8 = vld [vmem:[#allocation8 + $0x8] sm:$0xf0]  ;;  %v113_v20 = vld [vmem:[#allocation11 + $0x1] ss:$0 sm:$0xff]  ;;  %v846_v36 = vld [vmem:[#allocation10 + $0x70] sm:$0xff] }
  0x2b   :  { %334 = vmatpush.bf16.msra.mxu1 %v721_v42  ;;  %v836_v39 = vld [vmem:[#allocation10 + $0x20] sm:$0xff]  ;;  %v845_v42 = vld [vmem:[#allocation10 + $0x68] sm:$0xff]  ;;  %v835_v46 = vld [vmem:[#allocation10 + $0x18] sm:$0xff] }
  0x2c   :  { %v1113_v28 = vsel %vm208_vm0, %v861_v23, %v207_v27  ;;  %347 = vmatpush.bf16.msra.mxu2 %v725_v44  ;;  %v114_v23 = vld [vmem:[#allocation11 + $0x2] ss:$0 sm:$0xff]  ;;  %v839_v27 = vld [vmem:[#allocation10 + $0x38] sm:$0xff]  ;;  %v834_v53 = vld [vmem:[#allocation10 + $0x10] sm:$0xff] }
  0x2d   :  { %191 = vmatpush.bf16.msra.mxu0 %v811_v4  ;;  %v680_v4 = vld [vmem:[#allocation8] sm:$0xf]  ;;  %576 = vmatpush.bf16.msra.mxu3 %v839_v27  ;;  %v843_v58 = vld [vmem:[#allocation10 + $0x58] sm:$0xff]  ;;  %v833_v63 = vld [vmem:[#allocation10 + $0x8] sm:$0xff] }
  0x2e   :  { %v844_v49 = vld [vmem:[#allocation10 + $0x60] sm:$0xff] }
  0x2f   :  { %335 = vmatpush.bf16.msra.mxu1 %v713_v48 }
  0x30   :  { %348 = vmatpush.bf16.msra.mxu2 %v717_v50 }
  0x31   :  { %192 = vmatpush.bf16.msra.mxu0 %v810_v5  ;;  %v817_v5 = vld [vmem:[#allocation8 + $0x4] sm:$0xf0] }
  0x33   :  { %336 = vmatpush.bf16.msra.mxu1 %v705_v54 }
  0x34   :  { %349 = vmatpush.bf16.msra.mxu2 %v709_v56 }
  0x35   :  { %193 = vmatpush.bf16.msra.mxu0 %v809_v6  ;;  %v693_v6 = vor.u32 %v818_v1, %v690_v3  ;;  %v842_v3 = vld [vmem:[#allocation10 + $0x50] sm:$0xff] }
  0x37   :  { %337 = vmatpush.bf16.msra.mxu1 %v697_v60 }
  0x38   :  { %350 = vmatpush.bf16.msra.mxu2 %v701_v62 }
  0x39   :  { %194 = vmatpush.bf16.msra.mxu0 %v808_v7  ;;  %v816_v7 = vld [vmem:[#allocation8 + $0x4] sm:$0xf] }
  0x3b   :  { %338 = vmatpush.bf16.msra.mxu1 %v689_v2 }
  0x3c   :  { %195 = vmatmul.bf16.vlgmr.msra.gmra.mxu0 %v122_v9  ;;  %v681_v9 = vor.u32 %v817_v5, %v680_v4  ;;  %351 = vmatpush.bf16.msra.mxu2 %v693_v6 }
  0x3d   :  { %589 = vmatpush.bf16.msrb.mxu0 %v847_v33 }
  0x3f   :  { %339 = vmatpush.bf16.msra.mxu1 %v681_v9  ;;  %v841_v9 = vld [vmem:[#allocation10 + $0x48] sm:$0xff] }
  0x41   :  { %590 = vmatpush.bf16.msrb.mxu0 %v846_v36 }
  0x45   :  { %591 = vmatpush.bf16.msrb.mxu0 %v845_v42 }
  0x49   :  { %592 = vmatpush.bf16.msrb.mxu0 %v844_v49 }
  0x4d   :  { %593 = vmatpush.bf16.msrb.mxu0 %v843_v58 }
  0x51   :  { %594 = vmatpush.bf16.msrb.mxu0 %v842_v3 }
  0x55   :  { %595 = vmatpush.bf16.msrb.mxu0 %v841_v9 }
  0xb9   :  { %v196_v11 = vpop.f32.mrf.mxu0 }
  0xba   :  { %v197_v13 = vadd.f32 %v196_v11, %v112_v10  ;;  %v685_v10 = vor.u32 %v816_v7, %v682_v8  ;;  %v832_v8 = vld [vmem:[#allocation10] sm:$0xff] }
  0xbc   :  { %v200_v14 = vadd.f32 %v197_v13, %v120_v12  ;;  %352 = vmatpush.bf16.msra.mxu2 %v685_v10 }
  0xbe   :  { %201 = vadd.xlane.f32.xlu0 %v200_v14 }
  0xc1   :  { %v198_v15 = vpop.f32.mrf.mxu0 }
 0x131   :  { %v202_v29 = vpop.xlane.xlu0 %201 }
 0x132   :  { %v210_v30 = vmul.f32 %v1113_v28, %v202_v29  ;;  %v116_v29 = vld [vmem:[#allocation11 + $0x3] ss:$8 sm:$0x3] }
 0x133   :  { %v249_v38 = vperm.slane %v116_v29, 1 }
 0x134   :  { %v1116_v31 = vsub.f32 %v200_v14, %v210_v30  ;;  %v838_v30 = vld [vmem:[#allocation10 + $0x30] sm:$0xff] }
 0x135   :  { %577 = vmatpush.bf16.msra.mxu3 %v838_v30 }
 0x136   :  { %v212_v32 = vmul.f32 %v1116_v31, %v1116_v31 }
 0x138   :  { %213 = vadd.xlane.f32.xlu0 %v212_v32  ;;  %v248_v32 = vperm.slane %v116_v29, 0 }
 0x139   :  { %578 = vmatpush.bf16.msra.mxu3 %v837_v35 }
 0x13d   :  { %579 = vmatpush.bf16.msra.mxu3 %v836_v39 }
 0x141   :  { %580 = vmatpush.bf16.msra.mxu3 %v835_v46 }
 0x145   :  { %581 = vmatpush.bf16.msra.mxu3 %v834_v53 }
 0x149   :  { %582 = vmatpush.bf16.msra.mxu3 %v833_v63 }
 0x14d   :  { %583 = vmatpush.bf16.msra.mxu3 %v832_v8 }
 0x1ab   :  { %v214_v11 = vpop.xlane.xlu0 %213 }
 0x1ac   :  { %v215_v12 = vmul.f32 %v214_v11, %v1113_v28 }
 0x1ae   :  { %v216_v13 = vadd.f32 1e-05, %v215_v12 }
 0x1b0   :  { %862 = vrsqrt.f32 %v216_v13  ;;  %vm223_vm2 = vweird.f32 %v216_v13 }
 0x1b6   :  { %v863_v14 = vpop.eup %862 }
 0x1b7   :  { %v218_v15 = vmul.f32 %v863_v14, %v216_v13  ;;  %vm224_vm1 = vweird.f32 %v863_v14 }
 0x1b8   :  { %vm225_vm3 = vmor %vm223_vm2, %vm224_vm1 }
 0x1b9   :  { %v219_v16 = vmul.f32 %v863_v14, %v218_v15 }
 0x1bb   :  { %v220_v17 = vmul.f32 0.5, %v219_v16 }
 0x1bd   :  { %v221_v18 = vsub.f32 1.5, %v220_v17 }
 0x1bf   :  { %v222_v19 = vmul.f32 %v863_v14, %v221_v18 }
 0x1c1   :  { %v226_v21 = vsel %vm225_vm3, %v863_v14, %v222_v19  ;;  %v840_v19 = vld [vmem:[#allocation10 + $0x40] sm:$0xff] }
 0x1c2   :  { %v227_v22 = vmul.f32 %v226_v21, %v1116_v31  ;;  %596 = vmatpush.bf16.msrb.mxu0 %v840_v19 }
 0x1c4   :  { %v228_v24 = vmul.f32 %v227_v22, %v113_v20 }
 0x1c6   :  { %v1122_v25 = vadd.f32 %v228_v24, %v114_v23 }
 0x1c8   :  { %v230_v26 = vpack.c.bf16 %v1122_v25, %v1122_v25 }
 0x1ca   :  { %340 = vmatmul.bf16.vlgmr.msra.gmra.mxu1 %v230_v26  ;;  %353 = vmatmul.bf16.vlgmr.msra.gmra.mxu2 %v230_v26 }
 0x247   :  { %v341_v34 = vpop.f32.mrf.mxu1 }
 0x248   :  { %v1126_v31 = vadd.f32 %v341_v34, %v248_v32 }
 0x24a   :  { %v1129_v37 = vmul.f32 0.70710677, %v1126_v31  ;;  %v358_v63 = vmul.f32 0.5, %v1126_v31 }
 0x24c   :  { %v362_v40 = vmul.f32 %v1129_v37, %v1129_v37 }
 0x24d   :  { %v354_v41 = vpop.f32.mrf.mxu2 }
 0x24e   :  { %v1133_v43 = vmin.f32 %v362_v40, 16.0  ;;  %v1135_v44 = vadd.f32 %v354_v41, %v249_v38 }
 0x24f   :  { %v343_v45 = vpop.f32.mrf.mxu1 }
 0x250   :  { %v364_v47 = vmul.f32 2.1237322e-06, %v1133_v43  ;;  %v1139_v48 = vmul.f32 0.70710677, %v1135_v44  ;;  %v375_v50 = vmul.f32 3.8918573e-05, %v1133_v43 }
 0x252   :  { %v365_v51 = vadd.f32 0.00028619796, %v364_v47  ;;  %v402_v52 = vmul.f32 %v1139_v48, %v1139_v48  ;;  %v376_v54 = vadd.f32 0.001143296, %v375_v50 }
 0x254   :  { %v366_v55 = vmul.f32 %v365_v51, %v1133_v43  ;;  %v403_v56 = vmin.f32 %v402_v52, 16.0  ;;  %v377_v59 = vmul.f32 %v376_v54, %v1133_v43 }
 0x255   :  { %v356_v57 = vpop.f32.mrf.mxu2 }
 0x256   :  { %v404_v60 = vmul.f32 2.1237322e-06, %v403_v56  ;;  %v415_v61 = vmul.f32 3.8918573e-05, %v403_v56  ;;  %v367_v62 = vadd.f32 0.0036580483, %v366_v55 }
 0x257   :  { %v378_v0 = vadd.f32 0.014752088, %v377_v59 }
 0x258   :  { %v405_v1 = vadd.f32 0.00028619796, %v404_v60  ;;  %v416_v2 = vadd.f32 0.001143296, %v415_v61  ;;  %v368_v7 = vmul.f32 %v367_v62, %v1133_v43 }
 0x259   :  { %v379_v4 = vmul.f32 %v378_v0, %v1133_v43 }
 0x25a   :  { %v406_v5 = vmul.f32 %v405_v1, %v403_v56  ;;  %v417_v6 = vmul.f32 %v416_v2, %v403_v56  ;;  %v369_v15 = vadd.f32 0.05243302, %v368_v7 }
 0x25b   :  { %v380_v10 = vadd.f32 0.112945676, %v379_v4 }
 0x25c   :  { %v407_v11 = vadd.f32 0.0036580483, %v406_v5  ;;  %v418_v12 = vadd.f32 0.014752088, %v417_v6  ;;  %v370_v22 = vmul.f32 %v369_v15, %v1133_v43  ;;  %v359_v6 = vmul.f32 0.5, %v1135_v44 }
 0x25d   :  { %v381_v13 = vmul.f32 %v380_v10, %v1133_v43  ;;  %v117_v10 = vld [vmem:[#allocation11 + $0x4] ss:$0 sm:$0xff] }
 0x25e   :  { %v419_v14 = vmul.f32 %v418_v12, %v403_v56  ;;  %v408_v17 = vmul.f32 %v407_v11, %v403_v56  ;;  %v371_v29 = vadd.f32 0.18741608, %v370_v22 }
 0x25f   :  { %v382_v16 = vadd.f32 0.4994258, %v381_v13 }
 0x260   :  { %v420_v18 = vadd.f32 0.112945676, %v419_v14  ;;  %v409_v24 = vadd.f32 0.05243302, %v408_v17  ;;  %v372_v34 = vmul.f32 %v371_v29, %v1133_v43 }
 0x261   :  { %v383_v20 = vmul.f32 %v382_v16, %v1133_v43 }
 0x262   :  { %v421_v21 = vmul.f32 %v420_v18, %v403_v56  ;;  %v410_v30 = vmul.f32 %v409_v24, %v403_v56  ;;  %v373_v39 = vadd.f32 1.1283791, %v372_v34 }
 0x263   :  { %v384_v23 = vadd.f32 1.0, %v383_v20 }
 0x264   :  { %v422_v26 = vadd.f32 0.4994258, %v421_v21  ;;  %v411_v35 = vadd.f32 0.18741608, %v410_v30  ;;  %v374_v50 = vmul.f32 %v373_v39, %v1129_v37  ;;  %v118_v30 = vld [vmem:[#allocation11 + $0x5] ss:$0 sm:$0xff] }
 0x265   :  { %864 = vrcp.f32 %v384_v23  ;;  %v396_v40 = vand.u32 2147483648, %v384_v23  ;;  %v394_v46 = vand.u32 2147483647, %v384_v23  ;;  %vm390_vm5 = vweird.f32 %v384_v23 }
 0x266   :  { %v423_v27 = vmul.f32 %v422_v26, %v403_v56  ;;  %v412_v42 = vmul.f32 %v411_v35, %v403_v56 }
 0x267   :  { %v397_v52 = vor.u32 1.1754944e-38, %v396_v40  ;;  %vm395_vm7 = vcmp.eq.f32.partialorder %v394_v46, 8.507059e+37 }
 0x268   :  { %v424_v32 = vadd.f32 1.0, %v423_v27  ;;  %v413_v53 = vadd.f32 1.1283791, %v412_v42 }
 0x26a   :  { %866 = vrcp.f32 %v424_v32  ;;  %v436_v43 = vand.u32 2147483648, %v424_v32  ;;  %v434_v57 = vand.u32 2147483647, %v424_v32  ;;  %vm430_vm9 = vweird.f32 %v424_v32 }
 0x26b   :  { %v865_v33 = vpop.eup %864  ;;  %v414_v62 = vmul.f32 %v413_v53, %v1139_v48 }
 0x26c   :  { %v386_v36 = vmul.f32 %v865_v33, %v384_v23  ;;  %vm391_vm4 = vweird.f32 %v865_v33  ;;  %v437_v60 = vor.u32 1.1754944e-38, %v436_v43  ;;  %vm435_vm11 = vcmp.eq.f32.partialorder %v434_v57, 8.507059e+37 }
 0x26d   :  { %vm392_vm6 = vmor %vm390_vm5, %vm391_vm4 }
 0x26e   :  { %v387_v38 = vsub.f32 1.0, %v386_v36 }
 0x270   :  { %v867_v41 = vpop.eup %866  ;;  %v388_v45 = vmul.f32 %v865_v33, %v387_v38 }
 0x271   :  { %v426_v47 = vmul.f32 %v867_v41, %v424_v32  ;;  %vm431_vm8 = vweird.f32 %v867_v41 }
 0x272   :  { %v389_v49 = vadd.f32 %v865_v33, %v388_v45  ;;  %vm432_vm10 = vmor %vm430_vm9, %vm431_vm8 }
 0x273   :  { %v427_v51 = vsub.f32 1.0, %v426_v47 }
 0x274   :  { %v393_v54 = vsel %vm392_vm6, %v865_v33, %v389_v49  ;;  %v119_v33 = vld [vmem:[#allocation11 + $0x6] ss:$0 sm:$0xff] }
 0x275   :  { %v428_v55 = vmul.f32 %v867_v41, %v427_v51  ;;  %v398_v58 = vsel %vm395_vm7, %v397_v52, %v393_v54 }
 0x276   :  { %v399_v56 = vmul.f32 %v398_v58, %v374_v50 }
 0x277   :  { %v429_v59 = vadd.f32 %v867_v41, %v428_v55 }
 0x278   :  { %v742_v61 = vclamps-f32 %v399_v56, 1.0 }
 0x279   :  { %v433_v37 = vsel %vm432_vm10, %v867_v41, %v429_v59 }
 0x27a   :  { %v438_v0 = vsel %vm435_vm11, %v437_v60, %v433_v37  ;;  %v442_v1 = vadd.f32 1.0, %v742_v61 }
 0x27b   :  { %v439_v2 = vmul.f32 %v438_v0, %v414_v62 }
 0x27c   :  { %v444_v3 = vmul.f32 %v442_v1, %v358_v63 }
 0x27d   :  { %v743_v4 = vclamps-f32 %v439_v2, 1.0 }
 0x27e   :  { %v446_v5 = vpack.c.bf16 %v444_v3, %v444_v3 }
 0x27f   :  { %v443_v7 = vadd.f32 1.0, %v743_v4 }
 0x280   :  { %584 = vmatmul.bf16.vlgmr.msra.gmra.mxu3 %v446_v5 }
 0x281   :  { %v445_v8 = vmul.f32 %v443_v7, %v359_v6 }
 0x283   :  { %v447_v9 = vpack.c.bf16 %v445_v8, %v445_v8 }
 0x285   :  { %597 = vmatmul.bf16.vlgmr.msrb.gmra.mxu0 %v447_v9 }
 0x302   :  { %v598_v11 = vpop.f32.mrf.mxu0 }
 0x303   :  { %v585_v48 = vpop.f32.mrf.mxu3 }
 0x304   :  { %v586_v12 = vadd.f32 %v585_v48, %v117_v10 }
 0x306   :  { %v599_v13 = vadd.f32 %v598_v11, %v586_v12 }
 0x308   :  { %v602_v31 = vadd.f32 %v599_v13, %v1122_v25 }
 0x30a   :  { %603 = vadd.xlane.f32.xlu1 %v602_v31  ;;  %v600_v14 = vpop.f32.mrf.mxu0 }
 0x30b   :  { %v587_v15 = vpop.f32.mrf.mxu3 }
 0x37d   :  { %v604_v16 = vpop.xlane.xlu1 %603 }
 0x37e   :  { %v605_v17 = vmul.f32 %v604_v16, %v1113_v28 }
 0x380   :  { %v606_v18 = vsub.f32 %v602_v31, %v605_v17 }
 0x382   :  { %v607_v44 = vmul.f32 %v606_v18, %v606_v18 }
 0x384   :  { %608 = vadd.xlane.f32.xlu1 %v607_v44 }
 0x3f7   :  { %v609_v19 = vpop.xlane.xlu1 %608 }
 0x3f8   :  { %v610_v20 = vmul.f32 %v609_v19, %v1113_v28 }
 0x3fa   :  { %v611_v21 = vadd.f32 1e-05, %v610_v20 }
 0x3fc   :  { %868 = vrsqrt.f32 %v611_v21  ;;  %vm618_vm13 = vweird.f32 %v611_v21 }
 0x402   :  { %v869_v22 = vpop.eup %868 }
 0x403   :  { %v613_v23 = vmul.f32 %v869_v22, %v611_v21  ;;  %vm619_vm12 = vweird.f32 %v869_v22 }
 0x404   :  { %vm620_vm14 = vmor %vm618_vm13, %vm619_vm12 }
 0x405   :  { %v614_v24 = vmul.f32 %v869_v22, %v613_v23 }
 0x407   :  { %v615_v26 = vmul.f32 0.5, %v614_v24 }
 0x409   :  { %v616_v27 = vsub.f32 1.5, %v615_v26 }
 0x40b   :  { %v617_v25 = vmul.f32 %v869_v22, %v616_v27 }
 0x40d   :  { %v621_v29 = vsel %vm620_vm14, %v869_v22, %v617_v25 }
 0x40e   :  { %v622_v32 = vmul.f32 %v621_v29, %v606_v18 }
 0x410   :  { %v623_v28 = vmul.f32 %v622_v32, %v118_v30 }
 0x412   :  { %v624_v34 = vadd.f32 %v623_v28, %v119_v33 }
 0x414   :  { %625 = vst [vmem:[#allocation13] sm:$0xff] %v624_v34 }
 0x415   :  { %636 = dma.vmem_to_hbm [thread:$0]  %s632_s5, 128, %s634_s29, [#allocation4]  }
 0x416   :  { %1046 = dma.done.wait [#allocation4], 128  }
 0x417   :  { %1047 = vsyncadd [#allocation4], 4294967168 }
 0x418   :  { %641 = vsyncpa [#allocation3], 1 }
 0x419   :  { %642 = vsyncpa [#allocation6], 1 }
 0x41a   :  { %643 = vsyncpa [#allocation9], 1 }
 0x41b   :  { %644 = vsyncpa [#allocation12], 1 }
 0x41c   :  { %645 = vsyncpa [#allocation4], 1 }

</bundles_post_ra>
